<compile_context>
chip_gen: v6e
topology: v6e:2x2x1
jax: 0.10.0
libtpu: 0.0.40
codegen_flags: <defaults>
</compile_context>

<pallas_src>
import jax
import jax.numpy as jnp
from jax import lax
from jax.experimental import pallas as pl
from jax.experimental.pallas import tpu as pltpu


def _upsample_conv_kernel(xm_ref, xh_ref, w_ref, b_ref, o_ref):
    """One (batch, row-tile) grid step.

    xm_ref : (1, TH, W+2, Cin)    main TH rows of the zero-padded low-res input
    xh_ref : (1, 2,  W+2, Cin)    2-row bottom halo of the window
    w_ref  : (4, 4*Cin, Cout)     folded 2x2 tap weights per output phase p=2a+b
    b_ref  : (1, Cout)            bias (f32)
    o_ref  : (1, 2*TH, W, 2*Cout) output rows, already phase-interleaved: element
                                  [0, 2i+a, j, b*Cout+c] == y[2i+a, 2j+b, c]
    """
    _, TH, Wp2, Cin = xm_ref.shape
    W = Wp2 - 2
    Cout = w_ref.shape[-1]
    odt = o_ref.dtype

    # (TH + 2, W + 2, Cin) padded window for this row tile (main rows + halo).
    xw = jnp.concatenate([xm_ref[0], xh_ref[0]], axis=0)

    # Three column-shifted, row-flattened copies; every phase operand below is a
    # sublane-aligned (offset = multiple of W) row slice of one of these.
    xc = [xw[:, c:c + W, :].reshape((TH + 2) * W, Cin) for c in range(3)]

    bias = b_ref[...]                                       # (1, Cout) f32

    def phase(a, b):
        # im2col LHS for phase (a, b); K-block order (r, c) matches w_ref layout.
        r0 = slice((a + 0) * W, (a + 0 + TH) * W)
        r1 = slice((a + 1) * W, (a + 1 + TH) * W)
        lhs = jnp.concatenate([xc[b + 0][r0], xc[b + 1][r0],
                               xc[b + 0][r1], xc[b + 1][r1]], axis=-1)
        res = jnp.dot(lhs, w_ref[2 * a + b],
                      preferred_element_type=jnp.float32) + bias    # (TH*W, Cout) f32
        return res.astype(odt).reshape(TH, W, Cout)

    # Column-phase interleave = minor-dim concat; row-phase interleave = major-dim
    # concat + leading-dim reshape.  One dense store per grid step.
    col0 = jnp.concatenate([phase(0, 0), phase(0, 1)], axis=-1)     # (TH, W, 2*Cout)
    col1 = jnp.concatenate([phase(1, 0), phase(1, 1)], axis=-1)
    full = jnp.concatenate([col0[:, None], col1[:, None]], axis=1)  # (TH, 2, W, 2*Cout)
    o_ref[0] = full.reshape(2 * TH, W, 2 * Cout)


def _vmem_bytes(th, W, C, Cout, e, o):
    """Rough per-step VMEM footprint (pipeline buffers + in-kernel temporaries)."""
    inp = 2 * (th + 2) * (W + 2) * C * e                 # double-buffered inputs
    wgt = 2 * (16 * C * Cout * e + 4 * Cout)             # weights + bias buffers
    out = 2 * (2 * th) * W * (2 * Cout) * o              # double-buffered output
    tmp = ((th + 2) * (W + 2) * C * e                    # xw
           + 3 * (th + 2) * W * C * e                    # xc copies
           + 2 * 4 * th * W * C * e                      # live phase LHS
           + 2 * th * W * Cout * 4                       # f32 matmul results
           + 12 * th * W * Cout * o)                     # phase results + interleave
    return inp + wgt + out + tmp


def _pick_tile_h(H, W, C, Cout, e, o, budget):
    th_full = H + (H & 1)
    if _vmem_bytes(th_full, W, C, Cout, e, o) <= budget:
        return th_full
    th = min(th_full, 256)
    th -= th & 1
    while th > 2 and _vmem_bytes(th, W, C, Cout, e, o) > budget:
        th -= 2
    return max(th, 2)


def _vmem_limit_bytes():
    phys = 64 << 20
    try:
        phys = int(pltpu.get_tpu_info().vmem_capacity_bytes)
    except Exception:
        pass
    # Headroom for compiler-internal scratch: ~48 MiB on 64-MiB parts (v7x-class),
    # ~100 MiB on 128-MiB parts (v5e/v6e).
    return max(32 << 20, min(100 << 20, phys - (16 << 20)))


def upsample_forward(x_nchw, weight_hwio=None, bias=None, use_conv=True, *,
                     tile_h=None, compute_dtype=jnp.bfloat16, out_dtype=None,
                     data_format="NCHW"):
    """Mirrors Upsample.forward for dims=2.

    x_nchw      : (B, C, H, W)        (PyTorch NCHW convention)
    weight_hwio : (3, 3, Cin, Cout),  bias: (Cout,)
    returns     : (B, Cout, 2H, 2W)   if data_format == "NCHW" (module default)
                  (B, 2H, 2W, Cout)   if data_format == "NHWC" (no extra HBM pass)
    """
    B, C, H, W = x_nchw.shape
    x_nhwc = jnp.transpose(x_nchw, (0, 2, 3, 1))
    if not use_conv:
        xu = jnp.repeat(jnp.repeat(x_nhwc, 2, axis=1), 2, axis=2)
        return xu if data_format == "NHWC" else jnp.transpose(xu, (0, 3, 1, 2))

    assert weight_hwio.shape[:3] == (3, 3, C)
    Cout = weight_hwio.shape[-1]
    out_dtype = compute_dtype if out_dtype is None else out_dtype

    e = jnp.dtype(compute_dtype).itemsize
    o = jnp.dtype(out_dtype).itemsize
    vmem_limit = _vmem_limit_bytes()
    if tile_h is None:
        tile_h = _pick_tile_h(H, W, C, Cout, e, o, int(0.75 * vmem_limit))
    if tile_h >= H:
        tile_h = H + (H & 1)          # single tile, even (halo index needs even)
    else:
        tile_h = max(2, tile_h - (tile_h & 1))
    H_pad = ((H + tile_h - 1) // tile_h) * tile_h
    n_h = H_pad // tile_h

    # Zero-pad the ORIGINAL-resolution input: 1 on each spatial side plus extra
    # bottom rows so the row-tile grid covers H_pad; cast once to compute dtype.
    xp = jnp.pad(x_nhwc, ((0, 0), (1, 1 + (H_pad - H)), (1, 1), (0, 0)))
    xp = xp.astype(compute_dtype)

    # Fold (2x nearest upsample ∘ 3x3 pad-1 conv) into four per-phase 2x2 convs:
    #   y[2i+a, 2j+b] = sum_{r,c in {0,1}} xpad[i+a+r, j+b+c] @ Wp[a, b, r, c]
    taps = {0: ((0,), (1, 2)), 1: ((0, 1), (2,))}   # taps[a][r] -> contributing kh's
    w32 = weight_hwio.astype(jnp.float32)
    phase_w = []
    for a in (0, 1):
        for b in (0, 1):
            blocks = []
            for r in (0, 1):
                for c in (0, 1):
                    wt = jnp.zeros((C, Cout), jnp.float32)
                    for kh in taps[a][r]:
                        for kw in taps[b][c]:
                            wt = wt + w32[kh, kw]
                    blocks.append(wt)
            phase_w.append(jnp.concatenate(blocks, axis=0))          # (4*C, Cout)
    wp = jnp.stack(phase_w).astype(compute_dtype)                     # (4, 4*C, Cout)
    b2 = bias.reshape(1, Cout).astype(jnp.float32)

    out = pl.pallas_call(
        _upsample_conv_kernel,
        out_shape=jax.ShapeDtypeStruct((B, 2 * H_pad, W, 2 * Cout), out_dtype),
        grid_spec=pltpu.PrefetchScalarGridSpec(
            num_scalar_prefetch=0,
            grid=(B, n_h),
            in_specs=[
                pl.BlockSpec((1, tile_h, W + 2, C),
                             lambda bi, hi: (bi, hi, 0, 0)),
                pl.BlockSpec((1, 2, W + 2, C),
                             lambda bi, hi: (bi, (hi + 1) * (tile_h // 2), 0, 0)),
                pl.BlockSpec((4, 4 * C, Cout), lambda bi, hi: (0, 0, 0)),
                pl.BlockSpec((1, Cout), lambda bi, hi: (0, 0)),
            ],
            out_specs=pl.BlockSpec((1, 2 * tile_h, W, 2 * Cout),
                                   lambda bi, hi: (bi, hi, 0, 0)),
        ),
        compiler_params=pltpu.CompilerParams(
            dimension_semantics=("parallel", "parallel"),
            vmem_limit_bytes=vmem_limit),
    )(xp, xp, wp, b2)

    y = out[:, :2 * H] if H_pad != H else out
    y = y.reshape(B, 2 * H, 2 * W, Cout)            # free: identical memory layout
    if data_format == "NHWC":
        return y
    return jnp.transpose(y, (0, 3, 1, 2))


def _reference(x_nchw, weight_hwio, bias):
    x_nhwc = jnp.transpose(x_nchw, (0, 2, 3, 1))
    xu = jnp.repeat(jnp.repeat(x_nhwc, 2, axis=1), 2, axis=2)
    ref = lax.conv_general_dilated(
        xu, weight_hwio, window_strides=(1, 1), padding="SAME",
        dimension_numbers=("NHWC", "HWIO", "NHWC"),
        precision=lax.Precision.HIGHEST) + bias
    return jnp.transpose(ref, (0, 3, 1, 2))


if __name__ == "__main__":
    key = jax.random.PRNGKey(0)
    kx, kw, kb = jax.random.split(key, 3)

    # Case 1: module-default sizing (out_channels == channels), single row tile.
    B, C, H, W = 2, 4, 16, 16
    Cout = C
    x = jax.random.normal(kx, (B, C, H, W), dtype=jnp.float32)
    weight = jax.random.normal(kw, (3, 3, C, Cout), dtype=jnp.float32) * 0.1
    bias = jax.random.normal(kb, (Cout,), dtype=jnp.float32) * 0.1
    ref = _reference(x, weight, bias)

    # Exact-precision path (f32 operands + f32 output) -> tight tolerance.
    y32 = jax.block_until_ready(
        upsample_forward(x, weight, bias,
                         compute_dtype=jnp.float32, out_dtype=jnp.float32))
    assert y32.shape == (B, Cout, 2 * H, 2 * W), y32.shape
    assert jnp.allclose(y32, ref, atol=2e-4, rtol=2e-4), \
        float(jnp.max(jnp.abs(y32 - ref)))

    # Default fast path: bf16 MXU operands, f32 accumulation, bf16 HBM output.
    y16 = jax.block_until_ready(upsample_forward(x, weight, bias))
    assert y16.shape == (B, Cout, 2 * H, 2 * W), y16.shape
    assert y16.dtype == jnp.bfloat16
    assert jnp.allclose(y16.astype(jnp.float32), ref, atol=5e-2, rtol=5e-2), \
        float(jnp.max(jnp.abs(y16.astype(jnp.float32) - ref)))

    # NHWC output mode: zero post-kernel transposes.
    y_nhwc = jax.block_until_ready(
        upsample_forward(x, weight, bias, compute_dtype=jnp.float32,
                         out_dtype=jnp.float32, data_format="NHWC"))
    assert y_nhwc.shape == (B, 2 * H, 2 * W, Cout), y_nhwc.shape
    assert jnp.allclose(y_nhwc, jnp.transpose(ref, (0, 2, 3, 1)),
                        atol=2e-4, rtol=2e-4)

    # Case 2: multi-row-tile halo path, Cin != Cout, H NOT divisible by tile_h.
    k2x, k2w, k2b = jax.random.split(jax.random.PRNGKey(1), 3)
    B2, C2, H2, W2, Cout2 = 1, 8, 20, 16, 16
    x2 = jax.random.normal(k2x, (B2, C2, H2, W2), dtype=jnp.float32)
    w2 = jax.random.normal(k2w, (3, 3, C2, Cout2), dtype=jnp.float32) * 0.1
    bz2 = jax.random.normal(k2b, (Cout2,), dtype=jnp.float32) * 0.1
    ref2 = _reference(x2, w2, bz2)
    y2 = jax.block_until_ready(
        upsample_forward(x2, w2, bz2, tile_h=8,
                         compute_dtype=jnp.float32, out_dtype=jnp.float32))
    assert y2.shape == (B2, Cout2, 2 * H2, 2 * W2), y2.shape
    assert jnp.allclose(y2, ref2, atol=2e-4, rtol=2e-4), \
        float(jnp.max(jnp.abs(y2 - ref2)))

    # use_conv=False path (pure nearest upsample).
    yu = jax.block_until_ready(upsample_forward(x, use_conv=False))
    assert yu.shape == (B, C, 2 * H, 2 * W), yu.shape
    assert jnp.allclose(yu, jnp.repeat(jnp.repeat(x, 2, axis=2), 2, axis=3))

    print("KERNEL_OK")
</pallas_src>

<mosaic_0001>
module attributes {stable_mosaic.version = 11 : i64} {
  func.func @_upsample_conv_kernel(%arg0: i32, %arg1: i32, %arg2: memref<1x16x18x4xf32, #tpu.memory_space<vmem>>, %arg3: memref<1x2x18x4xf32, #tpu.memory_space<vmem>>, %arg4: memref<4x16x4xf32, #tpu.memory_space<vmem>>, %arg5: memref<1x4xf32, #tpu.memory_space<vmem>>, %arg6: memref<1x32x16x8xf32, #tpu.memory_space<vmem>>) attributes {dimension_semantics = [#tpu.dimension_semantics<parallel>, #tpu.dimension_semantics<parallel>], iteration_bounds = array<i64: 2, 1>, scalar_prefetch = 0 : i64, scratch_operands = 0 : i64, tpu.core_type = #tpu.core_type<tc>, window_params = [{transform_indices = @transform_0, window_bounds = array<i64: 1, 16, 18, 4>}, {transform_indices = @transform_1, window_bounds = array<i64: 1, 2, 18, 4>}, {pipeline_mode = #tpu.pipeline_mode<synchronous>, transform_indices = @transform_2, window_bounds = array<i64: 4, 16, 4>}, {pipeline_mode = #tpu.pipeline_mode<synchronous>, transform_indices = @transform_3, window_bounds = array<i64: 1, 4>}, {transform_indices = @transform_4, window_bounds = array<i64: 1, 32, 16, 8>}]} {
    %c0 = arith.constant 0 : index
    %c0_0 = arith.constant 0 : index
    %c0_1 = arith.constant 0 : index
    %c0_2 = arith.constant 0 : index
    %0 = vector.load %arg2[%c0, %c0_0, %c0_1, %c0_2] : memref<1x16x18x4xf32, #tpu.memory_space<vmem>>, vector<1x16x18x4xf32>
    %1 = vector.shape_cast %0 : vector<1x16x18x4xf32> to vector<16x18x4xf32>
    %c0_3 = arith.constant 0 : index
    %c0_4 = arith.constant 0 : index
    %c0_5 = arith.constant 0 : index
    %c0_6 = arith.constant 0 : index
    %2 = vector.load %arg3[%c0_3, %c0_4, %c0_5, %c0_6] : memref<1x2x18x4xf32, #tpu.memory_space<vmem>>, vector<1x2x18x4xf32>
    %3 = vector.shape_cast %2 : vector<1x2x18x4xf32> to vector<2x18x4xf32>
    %4 = tpu.concatenate %1, %3 in 0 : vector<16x18x4xf32>, vector<2x18x4xf32> -> vector<18x18x4xf32>
    %5 = vector.extract_strided_slice %4 {offsets = [0, 0, 0], sizes = [18, 16, 4], strides = [1, 1, 1]} : vector<18x18x4xf32> to vector<18x16x4xf32>
    %6 = vector.shape_cast %5 : vector<18x16x4xf32> to vector<288x4xf32>
    %7 = vector.extract_strided_slice %4 {offsets = [0, 1, 0], sizes = [18, 16, 4], strides = [1, 1, 1]} : vector<18x18x4xf32> to vector<18x16x4xf32>
    %8 = vector.shape_cast %7 : vector<18x16x4xf32> to vector<288x4xf32>
    %9 = vector.extract_strided_slice %4 {offsets = [0, 2, 0], sizes = [18, 16, 4], strides = [1, 1, 1]} : vector<18x18x4xf32> to vector<18x16x4xf32>
    %10 = vector.shape_cast %9 : vector<18x16x4xf32> to vector<288x4xf32>
    %c0_7 = arith.constant 0 : index
    %c0_8 = arith.constant 0 : index
    %11 = vector.load %arg5[%c0_7, %c0_8] : memref<1x4xf32, #tpu.memory_space<vmem>>, vector<1x4xf32>
    %12 = vector.extract_strided_slice %6 {offsets = [0, 0], sizes = [256, 4], strides = [1, 1]} : vector<288x4xf32> to vector<256x4xf32>
    %13 = vector.extract_strided_slice %8 {offsets = [0, 0], sizes = [256, 4], strides = [1, 1]} : vector<288x4xf32> to vector<256x4xf32>
    %14 = vector.extract_strided_slice %6 {offsets = [16, 0], sizes = [256, 4], strides = [1, 1]} : vector<288x4xf32> to vector<256x4xf32>
    %15 = vector.extract_strided_slice %8 {offsets = [16, 0], sizes = [256, 4], strides = [1, 1]} : vector<288x4xf32> to vector<256x4xf32>
    %16 = tpu.concatenate %12, %13, %14, %15 in 1 : vector<256x4xf32>, vector<256x4xf32>, vector<256x4xf32>, vector<256x4xf32> -> vector<256x16xf32>
    %c0_9 = arith.constant 0 : index
    %c0_10 = arith.constant 0 : index
    %c0_11 = arith.constant 0 : index
    %17 = vector.load %arg4[%c0_9, %c0_10, %c0_11] : memref<4x16x4xf32, #tpu.memory_space<vmem>>, vector<1x16x4xf32>
    %18 = vector.shape_cast %17 : vector<1x16x4xf32> to vector<16x4xf32>
    %cst = arith.constant dense<0.000000e+00> : vector<256x4xf32>
    %19 = tpu.matmul %16, %18, %cst {dimension_numbers = #tpu.dot_dimension_numbers<[1], [0], [0], [1], [0, 0, 1, 1], [], []>} : vector<256x16xf32>, vector<16x4xf32>, vector<256x4xf32> -> vector<256x4xf32>
    %20 = vector.broadcast %11 : vector<1x4xf32> to vector<256x4xf32>
    %21 = arith.addf %19, %20 : vector<256x4xf32>
    %22 = vector.shape_cast %21 : vector<256x4xf32> to vector<16x16x4xf32>
    %23 = vector.extract_strided_slice %8 {offsets = [0, 0], sizes = [256, 4], strides = [1, 1]} : vector<288x4xf32> to vector<256x4xf32>
    %24 = vector.extract_strided_slice %10 {offsets = [0, 0], sizes = [256, 4], strides = [1, 1]} : vector<288x4xf32> to vector<256x4xf32>
    %25 = vector.extract_strided_slice %8 {offsets = [16, 0], sizes = [256, 4], strides = [1, 1]} : vector<288x4xf32> to vector<256x4xf32>
    %26 = vector.extract_strided_slice %10 {offsets = [16, 0], sizes = [256, 4], strides = [1, 1]} : vector<288x4xf32> to vector<256x4xf32>
    %27 = tpu.concatenate %23, %24, %25, %26 in 1 : vector<256x4xf32>, vector<256x4xf32>, vector<256x4xf32>, vector<256x4xf32> -> vector<256x16xf32>
    %c1 = arith.constant 1 : index
    %c0_12 = arith.constant 0 : index
    %c0_13 = arith.constant 0 : index
    %28 = vector.load %arg4[%c1, %c0_12, %c0_13] : memref<4x16x4xf32, #tpu.memory_space<vmem>>, vector<1x16x4xf32>
    %29 = vector.shape_cast %28 : vector<1x16x4xf32> to vector<16x4xf32>
    %cst_14 = arith.constant dense<0.000000e+00> : vector<256x4xf32>
    %30 = tpu.matmul %27, %29, %cst_14 {dimension_numbers = #tpu.dot_dimension_numbers<[1], [0], [0], [1], [0, 0, 1, 1], [], []>} : vector<256x16xf32>, vector<16x4xf32>, vector<256x4xf32> -> vector<256x4xf32>
    %31 = vector.broadcast %11 : vector<1x4xf32> to vector<256x4xf32>
    %32 = arith.addf %30, %31 : vector<256x4xf32>
    %33 = vector.shape_cast %32 : vector<256x4xf32> to vector<16x16x4xf32>
    %34 = tpu.concatenate %22, %33 in 2 : vector<16x16x4xf32>, vector<16x16x4xf32> -> vector<16x16x8xf32>
    %35 = vector.extract_strided_slice %6 {offsets = [16, 0], sizes = [256, 4], strides = [1, 1]} : vector<288x4xf32> to vector<256x4xf32>
    %36 = vector.extract_strided_slice %8 {offsets = [16, 0], sizes = [256, 4], strides = [1, 1]} : vector<288x4xf32> to vector<256x4xf32>
    %37 = vector.extract_strided_slice %6 {offsets = [32, 0], sizes = [256, 4], strides = [1, 1]} : vector<288x4xf32> to vector<256x4xf32>
    %38 = vector.extract_strided_slice %8 {offsets = [32, 0], sizes = [256, 4], strides = [1, 1]} : vector<288x4xf32> to vector<256x4xf32>
    %39 = tpu.concatenate %35, %36, %37, %38 in 1 : vector<256x4xf32>, vector<256x4xf32>, vector<256x4xf32>, vector<256x4xf32> -> vector<256x16xf32>
    %c2 = arith.constant 2 : index
    %c0_15 = arith.constant 0 : index
    %c0_16 = arith.constant 0 : index
    %40 = vector.load %arg4[%c2, %c0_15, %c0_16] : memref<4x16x4xf32, #tpu.memory_space<vmem>>, vector<1x16x4xf32>
    %41 = vector.shape_cast %40 : vector<1x16x4xf32> to vector<16x4xf32>
    %cst_17 = arith.constant dense<0.000000e+00> : vector<256x4xf32>
    %42 = tpu.matmul %39, %41, %cst_17 {dimension_numbers = #tpu.dot_dimension_numbers<[1], [0], [0], [1], [0, 0, 1, 1], [], []>} : vector<256x16xf32>, vector<16x4xf32>, vector<256x4xf32> -> vector<256x4xf32>
    %43 = vector.broadcast %11 : vector<1x4xf32> to vector<256x4xf32>
    %44 = arith.addf %42, %43 : vector<256x4xf32>
    %45 = vector.shape_cast %44 : vector<256x4xf32> to vector<16x16x4xf32>
    %46 = vector.extract_strided_slice %8 {offsets = [16, 0], sizes = [256, 4], strides = [1, 1]} : vector<288x4xf32> to vector<256x4xf32>
    %47 = vector.extract_strided_slice %10 {offsets = [16, 0], sizes = [256, 4], strides = [1, 1]} : vector<288x4xf32> to vector<256x4xf32>
    %48 = vector.extract_strided_slice %8 {offsets = [32, 0], sizes = [256, 4], strides = [1, 1]} : vector<288x4xf32> to vector<256x4xf32>
    %49 = vector.extract_strided_slice %10 {offsets = [32, 0], sizes = [256, 4], strides = [1, 1]} : vector<288x4xf32> to vector<256x4xf32>
    %50 = tpu.concatenate %46, %47, %48, %49 in 1 : vector<256x4xf32>, vector<256x4xf32>, vector<256x4xf32>, vector<256x4xf32> -> vector<256x16xf32>
    %c3 = arith.constant 3 : index
    %c0_18 = arith.constant 0 : index
    %c0_19 = arith.constant 0 : index
    %51 = vector.load %arg4[%c3, %c0_18, %c0_19] : memref<4x16x4xf32, #tpu.memory_space<vmem>>, vector<1x16x4xf32>
    %52 = vector.shape_cast %51 : vector<1x16x4xf32> to vector<16x4xf32>
    %cst_20 = arith.constant dense<0.000000e+00> : vector<256x4xf32>
    %53 = tpu.matmul %50, %52, %cst_20 {dimension_numbers = #tpu.dot_dimension_numbers<[1], [0], [0], [1], [0, 0, 1, 1], [], []>} : vector<256x16xf32>, vector<16x4xf32>, vector<256x4xf32> -> vector<256x4xf32>
    %54 = vector.broadcast %11 : vector<1x4xf32> to vector<256x4xf32>
    %55 = arith.addf %53, %54 : vector<256x4xf32>
    %56 = vector.shape_cast %55 : vector<256x4xf32> to vector<16x16x4xf32>
    %57 = tpu.concatenate %45, %56 in 2 : vector<16x16x4xf32>, vector<16x16x4xf32> -> vector<16x16x8xf32>
    %58 = vector.shape_cast %34 : vector<16x16x8xf32> to vector<16x1x16x8xf32>
    %59 = vector.shape_cast %57 : vector<16x16x8xf32> to vector<16x1x16x8xf32>
    %60 = tpu.concatenate %58, %59 in 1 : vector<16x1x16x8xf32>, vector<16x1x16x8xf32> -> vector<16x2x16x8xf32>
    %61 = vector.shape_cast %60 : vector<16x2x16x8xf32> to vector<32x16x8xf32>
    %c0_21 = arith.constant 0 : index
    %c0_22 = arith.constant 0 : index
    %c0_23 = arith.constant 0 : index
    %c0_24 = arith.constant 0 : index
    %62 = vector.load %arg6[%c0_21, %c0_22, %c0_23, %c0_24] : memref<1x32x16x8xf32, #tpu.memory_space<vmem>>, vector<1x32x16x8xf32>
    %63 = vector.shape_cast %62 : vector<1x32x16x8xf32> to vector<32x16x8xf32>
    %64 = vector.shape_cast %61 : vector<32x16x8xf32> to vector<1x32x16x8xf32>
    tpu.vector_store %arg6[%c0_21, %c0_22, %c0_23, %c0_24], %64 {strides = array<i32>} : memref<1x32x16x8xf32, #tpu.memory_space<vmem>>, vector<1x32x16x8xf32>,
    return
  }
  func.func @transform_0(%arg0: i32, %arg1: i32) -> (i32, i32, i32, i32) {
    %c0_i32 = arith.constant 0 : i32
    %c0_i32_0 = arith.constant 0 : i32
    %c0_i32_1 = arith.constant 0 : i32
    return %arg0, %arg1, %c0_i32, %c0_i32_0 : i32, i32, i32, i32
  }
  func.func @transform_1(%arg0: i32, %arg1: i32) -> (i32, i32, i32, i32) {
    %c1_i32 = arith.constant 1 : i32
    %0 = arith.addi %arg1, %c1_i32 : i32
    %c8_i32 = arith.constant 8 : i32
    %1 = arith.muli %0, %c8_i32 : i32
    %c0_i32 = arith.constant 0 : i32
    %c0_i32_0 = arith.constant 0 : i32
    %c0_i32_1 = arith.constant 0 : i32
    return %arg0, %1, %c0_i32, %c0_i32_0 : i32, i32, i32, i32
  }
  func.func @transform_2(%arg0: i32, %arg1: i32) -> (i32, i32, i32) {
    %c0_i32 = arith.constant 0 : i32
    %c0_i32_0 = arith.constant 0 : i32
    %c0_i32_1 = arith.constant 0 : i32
    %c0_i32_2 = arith.constant 0 : i32
    return %c0_i32, %c0_i32_0, %c0_i32_1 : i32, i32, i32
  }
  func.func @transform_3(%arg0: i32, %arg1: i32) -> (i32, i32) {
    %c0_i32 = arith.constant 0 : i32
    %c0_i32_0 = arith.constant 0 : i32
    %c0_i32_1 = arith.constant 0 : i32
    return %c0_i32, %c0_i32_0 : i32, i32
  }
  func.func @transform_4(%arg0: i32, %arg1: i32) -> (i32, i32, i32, i32) {
    %c0_i32 = arith.constant 0 : i32
    %c0_i32_0 = arith.constant 0 : i32
    %c0_i32_1 = arith.constant 0 : i32
    return %arg0, %arg1, %c0_i32, %c0_i32_0 : i32, i32, i32, i32
  }
}

</mosaic_0001>

<bundles_post_ra>
// kernel: tpu_custom_call.1
= control target key start
LH: loop header
LB: loop body
LE: loop exit
PB: predicated region body
PF: predicated region fallthrough
CT: control target
= control target key end

     0   :  { %s3697_s15 = smov 0   ;;  %s3699_s16 = smov 0   ;;  %s5700_s0 = inlined_call_operand.vmem [shape: f32[2,18,18,4], index: 0, kind: input, shape index: {}]   ;;  %s5701_s1 = inlined_call_operand.vmem [shape: f32[2,18,18,4], index: 1, kind: input, shape index: {}]   ;;  %s5702_s2 = inlined_call_operand.vmem [shape: f32[4,16,4], index: 2, kind: input, shape index: {}]   ;;  %s5703_s3 = inlined_call_operand.vmem [shape: f32[1,4], index: 3, kind: input, shape index: {}]   ;;  %s5704_s4 = inlined_call_operand.vmem [shape: f32[2,32,16,8], index: 4, kind: output, shape index: {}]  }
   0x1   :  { %s3701_s17 = smov 0  }
   0x2 LB: > { %s26_s18 = sadd.s32 1, %s3663_s16  ;;  %p3091_p0 = scmp.ge.s32.totalorder %s3667_s17, 1  ;;  %s3667_s17 = sphi %s3701_s17, %s14_s17   ;;  %s3663_s16 = sphi %s3699_s16, %s5887_s16   ;;  %s3659_s15 = sphi %s3697_s15, %s5886_s15  }
   0x3   : > { %p28_p1 = scmp.ge.s32.totalorder %s26_s18, 2  ;;  %p220_p2 = scmp.lt.s32.totalorder %s3667_s17, 3 }
   0x5   : > { %s5889_s18 = smov (%p28_p1, %s26_s18), 0  ;;  %p221_p3 = pnand %p3091_p0, %p220_p2 }
   0x7   : > { %224 = sbr.rel (%p221_p3) target bundleno = 846 (0x34e), region = 36 }
   0xc   : > { %p279_p4 = scmp.lt.s32.totalorder %s3659_s15, 1  ;;  %vm428_vm0 = vcmask 1046528   ;;  %s3669_s23 = smov 4   ;;  %vm553_vm1 = vcmask 1045504   ;;  %vm933_vm2 = vcmask 31744   ;;  %vm966_vm3 = vcmask 64512  }
   0xd   : > { %s3670_s24 = smov 8   ;;  %s3671_s29 = smov 12   ;;  %vm999_vm4 = vcmask 97280   ;;  %vm1040_vm5 = vcmask 130048  }
   0xe   : > { %s5891_s15 = smov (!%p279_p4, %s3659_s15), 1 }
   0xf   : > { %s3580_s19 = smul.u32 432, %s5891_s15 }
  0x11   : > { %s3723_s22 = scalar_lea.vmem %s5700_s0, %s3580_s19  ;;  %s3234_s10 = sadd.s32 384, %s3580_s19 }
  0x12   : > { %v3726_v0 = vld [vmem:[%s3723_s22 + $0x18] sm:$0xff]  ;;  %v3729_v1 = vld [vmem:[%s3723_s22 + $0x20] sm:$0xff]  ;;  %v3737_v5 = vld [vmem:[%s3723_s22 + $0x8] sm:$0xff]  ;;  %s4485_s13 = scalar_lea.vmem %s5701_s1, %s3234_s10 }
  0x13   : > { %v3732_v2 = vld [vmem:[%s3723_s22] sm:$0xff]  ;;  %v434_v3 = vrot.slane %v3726_v0, 1  ;;  %v435_v4 = vrot.slane %v3729_v1, 1  ;;  %v3741_v7 = vld [vmem:[%s3723_s22 + $0x28] sm:$0x3]  ;;  %v430_v8 = vrot.slane %v3737_v5, 1 }
  0x14   : > { %v429_v6 = vrot.slane %v3732_v2, 1  ;;  %v437_v9 = vrot.slane %v3741_v7, 1  ;;  %v3746_v10 = vld [vmem:[%s3723_s22 + $0x10] sm:$0x3]  ;;  %v3749_v11 = vld [vmem:[%s3723_s22 + $0x38] sm:$0xff]  ;;  %v3784_v24 = vld [vmem:[%s3723_s22 + $0x48] sm:$0xff] }
  0x15   : > { %v3752_v12 = vsel %vm428_vm0, %v434_v3, %v435_v4  ;;  %v432_v13 = vrot.slane %v3746_v10, 1  ;;  %v3756_v14 = vld [vmem:[%s3723_s22 + $0x40] sm:$0x3]  ;;  %v3759_v15 = vld [vmem:[%s3723_s22 + $0x30] sm:$0xff]  ;;  %v440_v18 = vrot.slane %v3749_v11, 1  ;;  %v444_v29 = vrot.slane %v3784_v24, 1 }
  0x16   : > { %649 = vrot.lane.b32.xlu1 %v3752_v12, %s3669_s23  ;;  %v3764_v16 = vsel %vm428_vm0, %v429_v6, %v430_v8  ;;  %v3769_v17 = vsel %vm428_vm0, %v435_v4, %v437_v9  ;;  %v442_v19 = vrot.slane %v3756_v14, 1  ;;  %v439_v21 = vrot.slane %v3759_v15, 1  ;;  %v3778_v22 = vld [vmem:[%s3723_s22 + $0x50] sm:$0xff]  ;;  %v3781_v23 = vld [vmem:[%s3723_s22 + $0x58] sm:$0x3]  ;;  %v3800_v30 = vld [vmem:[%s3723_s22 + $0x68] sm:$0xff] }
  0x17   : > { %5746 = vst [vmem:[#allocation2_spill] sm:$0xff] %v3764_v16  ;;  %645 = vrot.lane.b32.xlu0 %v3764_v16, %s3669_s23  ;;  %v3774_v20 = vsel %vm428_vm0, %v430_v8, %v432_v13  ;;  %v445_v26 = vrot.slane %v3778_v22, 1  ;;  %v447_v27 = vrot.slane %v3781_v23, 1  ;;  %v3803_v31 = vld [vmem:[%s3723_s22 + $0x70] sm:$0x3]  ;;  %v3806_v32 = vld [vmem:[%s3723_s22 + $0x60] sm:$0xff] }
  0x18   : > { %5747 = vst [vmem:[#allocation3_spill] sm:$0xff] %v3774_v20  ;;  %v3791_v25 = vsel %vm428_vm0, %v440_v18, %v442_v19  ;;  %v3796_v28 = vsel %vm428_vm0, %v439_v21, %v440_v18  ;;  %v450_v34 = vrot.slane %v3800_v30, 1  ;;  %v452_v35 = vrot.slane %v3803_v31, 1  ;;  %v3822_v38 = vld [vmem:[%s3723_s22 + $0x80] sm:$0xff]  ;;  %v3825_v39 = vld [vmem:[%s3723_s22 + $0x88] sm:$0x3] }
  0x19   : > { %v3813_v33 = vsel %vm428_vm0, %v445_v26, %v447_v27  ;;  %v3818_v36 = vsel %vm428_vm0, %v444_v29, %v445_v26  ;;  %v449_v37 = vrot.slane %v3806_v32, 1  ;;  %v3828_v40 = vld [vmem:[%s3723_s22 + $0x78] sm:$0xff]  ;;  %v455_v42 = vrot.slane %v3822_v38, 1  ;;  %v3847_v47 = vld [vmem:[%s3723_s22 + $0xa0] sm:$0x3]  ;;  %v3850_v48 = vld [vmem:[%s3723_s22 + $0x90] sm:$0xff] }
  0x1a   : > { %651 = vrot.lane.b32.xlu1 %v3769_v17, %s3669_s23  ;;  %v3835_v41 = vsel %vm428_vm0, %v450_v34, %v452_v35  ;;  %v457_v43 = vrot.slane %v3825_v39, 1  ;;  %v454_v45 = vrot.slane %v3828_v40, 1  ;;  %v3844_v46 = vld [vmem:[%s3723_s22 + $0x98] sm:$0xff]  ;;  %v462_v51 = vrot.slane %v3847_v47, 1  ;;  %v3866_v54 = vld [vmem:[%s3723_s22 + $0xb0] sm:$0xff]  ;;  %v3872_v56 = vld [vmem:[%s3723_s22 + $0xa8] sm:$0xff] }
  0x1b   : > { %647 = vrot.lane.b32.xlu0 %v3774_v20, %s3669_s23  ;;  %v3840_v44 = vsel %vm428_vm0, %v449_v37, %v450_v34  ;;  %v460_v50 = vrot.slane %v3844_v46, 1  ;;  %v459_v53 = vrot.slane %v3850_v48, 1  ;;  %v3869_v55 = vld [vmem:[%s3723_s22 + $0xb8] sm:$0x3]  ;;  %v465_v58 = vrot.slane %v3866_v54, 1  ;;  %v3888_v62 = vld [vmem:[%s3723_s22 + $0xc8] sm:$0xff] }
  0x1c   : > { %v3857_v49 = vsel %vm428_vm0, %v455_v42, %v457_v43  ;;  %v3862_v52 = vsel %vm428_vm0, %v454_v45, %v455_v42  ;;  %v467_v59 = vrot.slane %v3869_v55, 1  ;;  %v464_v61 = vrot.slane %v3872_v56, 1  ;;  %v3891_v63 = vld [vmem:[%s3723_s22 + $0xd0] sm:$0x3]  ;;  %v3894_v3 = vld [vmem:[%s3723_s22 + $0xc0] sm:$0xff]  ;;  %v3916_v21 = vld [vmem:[%s3723_s22 + $0xd8] sm:$0xff] }
  0x1d   : > { %v3879_v57 = vsel %vm428_vm0, %v460_v50, %v462_v51  ;;  %v3884_v60 = vsel %vm428_vm0, %v459_v53, %v460_v50  ;;  %v470_v6 = vrot.slane %v3888_v62, 1  ;;  %v472_v8 = vrot.slane %v3891_v63, 1  ;;  %v3910_v18 = vld [vmem:[%s3723_s22 + $0xe0] sm:$0xff]  ;;  %v3913_v19 = vld [vmem:[%s3723_s22 + $0xe8] sm:$0x3]  ;;  %v3932_v37 = vld [vmem:[%s3723_s22 + $0xf8] sm:$0xff] }
  0x1e   : > { %655 = vrot.lane.b32.xlu1 %v3791_v25, %s3669_s23  ;;  %v3901_v4 = vsel %vm428_vm0, %v465_v58, %v467_v59  ;;  %v3906_v9 = vsel %vm428_vm0, %v464_v61, %v465_v58  ;;  %v469_v13 = vrot.slane %v3894_v3, 1  ;;  %v475_v27 = vrot.slane %v3910_v18, 1  ;;  %5748 = vst [vmem:[#allocation4_spill] sm:$0xff] %v3932_v37  ;;  %v3935_v42 = vld [vmem:[%s3723_s22 + $0x100] sm:$0x3]  ;;  %v3938_v43 = vld [vmem:[%s3723_s22 + $0xf0] sm:$0xff] }
  0x1f   : > { %653 = vrot.lane.b32.xlu0 %v3796_v28, %s3669_s23  ;;  %v3923_v26 = vsel %vm428_vm0, %v470_v6, %v472_v8  ;;  %v477_v29 = vrot.slane %v3913_v19, 1  ;;  %v474_v35 = vrot.slane %v3916_v21, 1  ;;  %5749 = vst [vmem:[#allocation5_spill] sm:$0xff] %v3935_v42  ;;  %v480_v50 = vrot.slane %v3932_v37, 1  ;;  %v3954_v59 = vld [vmem:[%s3723_s22 + $0x110] sm:$0xff]  ;;  %v3976_v20 = vld [vmem:[%s3723_s22 + $0x128] sm:$0xff] }
  0x20   : > { %v3928_v34 = vsel %vm428_vm0, %v469_v13, %v470_v6  ;;  %v482_v51 = vrot.slane %v3935_v42, 1  ;;  %v479_v58 = vrot.slane %v3938_v43, 1  ;;  %5750 = vst [vmem:[#allocation6_spill] sm:$0xff] %v3954_v59  ;;  %v3957_v61 = vld [vmem:[%s3723_s22 + $0x118] sm:$0x3]  ;;  %v3960_v6 = vld [vmem:[%s3723_s22 + $0x108] sm:$0xff] }
  0x21   : > { %v3945_v45 = vsel %vm428_vm0, %v475_v27, %v477_v29  ;;  %v3950_v53 = vsel %vm428_vm0, %v474_v35, %v475_v27  ;;  %5751 = vst [vmem:[#allocation7_spill] sm:$0xff] %v3957_v61  ;;  %5752 = vst [vmem:[#allocation8_spill] sm:$0xff] %v3960_v6  ;;  %v485_v13 = vrot.slane %v3954_v59, 1  ;;  %v487_v27 = vrot.slane %v3957_v61, 1  ;;  %v3979_v16 = vld [vmem:[%s3723_s22 + $0x130] sm:$0x3] }
  0x22   : > { %659 = vrot.lane.b32.xlu1 %v3813_v33, %s3669_s23  ;;  %v3967_v8 = vsel %vm428_vm0, %v480_v50, %v482_v51  ;;  %v3972_v29 = vsel %vm428_vm0, %v479_v58, %v480_v50  ;;  %v484_v35 = vrot.slane %v3960_v6, 1  ;;  %5755 = vst [vmem:[#allocation11_spill] sm:$0xff] %v3976_v20  ;;  %5756 = vst [vmem:[#allocation12_spill] sm:$0xff] %v3979_v16  ;;  %v3982_v42 = vld [vmem:[%s3723_s22 + $0x120] sm:$0xff]  ;;  %v490_v50 = vrot.slane %v3976_v20, 1 }
  0x23   : > { %657 = vrot.lane.b32.xlu0 %v3818_v36, %s3669_s23  ;;  %5753 = vst [vmem:[#allocation9_spill] sm:$0xff] %v3967_v8  ;;  %5754 = vst [vmem:[#allocation10_spill] sm:$0xff] %v3972_v29  ;;  %v3989_v51 = vsel %vm428_vm0, %v485_v13, %v487_v27  ;;  %v492_v58 = vrot.slane %v3979_v16, 1  ;;  %v489_v59 = vrot.slane %v3982_v42, 1  ;;  %v3998_v6 = vld [vmem:[%s3723_s22 + $0x140] sm:$0xff] }
  0x24   : > { %5757 = vst [vmem:[#allocation13_spill] sm:$0xff] %v3982_v42  ;;  %5758 = vst [vmem:[#allocation14_spill] sm:$0xff] %v3989_v51  ;;  %v3994_v61 = vsel %vm428_vm0, %v484_v35, %v485_v13  ;;  %v495_v13 = vrot.slane %v3998_v6, 1  ;;  %v4020_v42 = vld [vmem:[%s3723_s22 + $0x158] sm:$0xff] }
  0x25   : > { %5759 = vst [vmem:[#allocation15_spill] sm:$0xff] %v3994_v61  ;;  %5760 = vst [vmem:[#allocation16_spill] sm:$0xff] %v3998_v6  ;;  %v4011_v27 = vsel %vm428_vm0, %v490_v50, %v492_v58  ;;  %v4016_v16 = vsel %vm428_vm0, %v489_v59, %v490_v50  ;;  %v500_v59 = vrot.slane %v4020_v42, 1  ;;  %v4045_v37 = vld [vmem:[%s3723_s22 + $0x178] sm:$0x3] }
  0x26   : > { %663 = vrot.lane.b32.xlu1 %v3835_v41, %s3669_s23  ;;  %5763 = vst [vmem:[#allocation19_spill] sm:$0xff] %v4011_v27  ;;  %5764 = vst [vmem:[#allocation20_spill] sm:$0xff] %v4020_v42 }
  0x27   : > { %661 = vrot.lane.b32.xlu0 %v3840_v44, %s3669_s23 }
  0x2a   : > { %667 = vrot.lane.b32.xlu1 %v3857_v49, %s3669_s23 }
  0x2b   : > { %665 = vrot.lane.b32.xlu0 %v3862_v52, %s3669_s23 }
  0x2e   : > { %671 = vrot.lane.b32.xlu1 %v3879_v57, %s3669_s23 }
  0x2f   : > { %669 = vrot.lane.b32.xlu0 %v3884_v60, %s3669_s23 }
  0x32   : > { %675 = vrot.lane.b32.xlu1 %v3901_v4, %s3669_s23 }
  0x33   : > { %673 = vrot.lane.b32.xlu0 %v3906_v9, %s3669_s23 }
  0x36   : > { %679 = vrot.lane.b32.xlu1 %v3923_v26, %s3669_s23 }
  0x37   : > { %677 = vrot.lane.b32.xlu0 %v3928_v34, %s3669_s23 }
  0x3a   : > { %683 = vrot.lane.b32.xlu1 %v3945_v45, %s3669_s23 }
  0x3b   : > { %681 = vrot.lane.b32.xlu0 %v3950_v53, %s3669_s23 }
  0x3e   : > { %687 = vrot.lane.b32.xlu1 %v3967_v8, %s3669_s23  ;;  %v4001_v8 = vld [vmem:[%s3723_s22 + $0x148] sm:$0x3] }
  0x3f   : > { %685 = vrot.lane.b32.xlu0 %v3972_v29, %s3669_s23  ;;  %5761 = vst [vmem:[#allocation17_spill] sm:$0xff] %v4001_v8  ;;  %v4004_v29 = vld [vmem:[%s3723_s22 + $0x138] sm:$0xff]  ;;  %v497_v35 = vrot.slane %v4001_v8, 1 }
  0x40   : > { %5762 = vst [vmem:[#allocation18_spill] sm:$0xff] %v4004_v29  ;;  %v494_v20 = vrot.slane %v4004_v29, 1  ;;  %v4042_v29 = vld [vmem:[%s3723_s22 + $0x170] sm:$0xff] }
  0x41   : > { %v4033_v58 = vsel %vm428_vm0, %v495_v13, %v497_v35 }
  0x42   : > { %691 = vrot.lane.b32.xlu1 %v3989_v51, %s3669_s23  ;;  %v4023_v51 = vld [vmem:[%s3723_s22 + $0x160] sm:$0x3]  ;;  %v4038_v8 = vsel %vm428_vm0, %v494_v20, %v495_v13  ;;  %v505_v20 = vrot.slane %v4042_v29, 1  ;;  %v507_v13 = vrot.slane %v4045_v37, 1 }
  0x43   : > { %689 = vrot.lane.b32.xlu0 %v3994_v61, %s3669_s23  ;;  %5765 = vst [vmem:[#allocation21_spill] sm:$0xff] %v4023_v51  ;;  %v4026_v61 = vld [vmem:[%s3723_s22 + $0x150] sm:$0xff]  ;;  %v502_v50 = vrot.slane %v4023_v51, 1 }
  0x44   : > { %5766 = vst [vmem:[#allocation22_spill] sm:$0xff] %v4026_v61  ;;  %v499_v6 = vrot.slane %v4026_v61, 1  ;;  %v4068_v61 = vsel %vm428_vm0, %v505_v20, %v507_v13  ;;  %v559_v13 = vrot.slane %v3726_v0, 2 }
  0x45   : > { %v4055_v35 = vsel %vm428_vm0, %v500_v59, %v502_v50  ;;  %5767 = vst [vmem:[#allocation23_spill] sm:$0xff] %v4068_v61 }
  0x46   : > { %695 = vrot.lane.b32.xlu1 %v4011_v27, %s3669_s23  ;;  %v4048_v27 = vld [vmem:[%s3723_s22 + $0x168] sm:$0xff]  ;;  %v4060_v51 = vsel %vm428_vm0, %v499_v6, %v500_v59  ;;  %v555_v6 = vrot.slane %v3737_v5, 2  ;;  %v3130_v59 = vld [vmem:[%s5702_s2 + $0x18] sm:$0xff]  ;;  %v557_v5 = vrot.slane %v3746_v10, 2 }
  0x47   : > { %693 = vrot.lane.b32.xlu0 %v4016_v16, %s3669_s23  ;;  %v504_v42 = vrot.slane %v4048_v27, 1  ;;  %3424 = vmatprep.subr.mxu1 %v3130_v59 }
  0x48   : > { %3425 = vmatpush3.msra.mxu1 %v3130_v59  ;;  %v562_v59 = vrot.slane %v3741_v7, 2 }
  0x49   : > { %v4071_v50 = vsel %vm428_vm0, %v504_v42, %v505_v20  ;;  %v554_v42 = vrot.slane %v3732_v2, 2  ;;  %v3129_v2 = vld [vmem:[%s5702_s2 + $0x10] sm:$0xff] }
  0x4a   : > { %699 = vrot.lane.b32.xlu1 %v4033_v58, %s3669_s23  ;;  %3426 = vmatprep.subr.mxu1 %v3129_v2 }
  0x4b   : > { %697 = vrot.lane.b32.xlu0 %v4038_v8, %s3669_s23  ;;  %v556_v20 = vsel %vm553_vm1, %v554_v42, %v555_v6  ;;  %3427 = vmatpush3.msra.mxu1 %v3129_v2  ;;  %v558_v42 = vsel %vm553_vm1, %v555_v6, %v557_v5  ;;  %v565_v6 = vrot.slane %v3749_v11, 2  ;;  %v570_v5 = vrot.slane %v3778_v22, 2 }
  0x4e   : > { %703 = vrot.lane.b32.xlu1 %v4055_v35, %s3669_s23 }
  0x4f   : > { %701 = vrot.lane.b32.xlu0 %v4060_v51, %s3669_s23 }
  0x52   : > { %707 = vrot.lane.b32.xlu1 %v4068_v61, %s3669_s23  ;;  %v560_v61 = vrot.slane %v3729_v1, 2 }
  0x53   : > { %705 = vrot.lane.b32.xlu0 %v4071_v50, %s3669_s23 }
  0x54   : > { %v561_v10 = vsel %vm553_vm1, %v559_v13, %v560_v61 }
  0x56   : > { %743 = vrot.lane.b32.xlu1 %v3729_v1, %s3670_s24  ;;  %v564_v1 = vrot.slane %v3759_v15, 2 }
  0x57   : > { %741 = vrot.lane.b32.xlu0 %v3726_v0, %s3670_s24  ;;  %v563_v0 = vsel %vm553_vm1, %v560_v61, %v562_v59  ;;  %v572_v59 = vrot.slane %v3781_v23, 2  ;;  %v575_v23 = vrot.slane %v3800_v30, 2 }
  0x58   : > { %v566_v7 = vsel %vm553_vm1, %v564_v1, %v565_v6 }
  0x5a   : > { %747 = vrot.lane.b32.xlu1 %v3749_v11, %s3670_s24  ;;  %v569_v11 = vrot.slane %v3784_v24, 2 }
  0x5b   : > { %745 = vrot.lane.b32.xlu0 %v3759_v15, %s3670_s24 }
  0x5e   : > { %751 = vrot.lane.b32.xlu1 %v3778_v22, %s3670_s24 }
  0x5f   : > { %749 = vrot.lane.b32.xlu0 %v3784_v24, %s3670_s24  ;;  %v573_v24 = vsel %vm553_vm1, %v570_v5, %v572_v59 }
  0x62   : > { %755 = vrot.lane.b32.xlu1 %v3800_v30, %s3670_s24 }
  0x63   : > { %753 = vrot.lane.b32.xlu0 %v3806_v32, %s3670_s24 }
  0x66   : > { %759 = vrot.lane.b32.xlu1 %v3822_v38, %s3670_s24 }
  0x67   : > { %757 = vrot.lane.b32.xlu0 %v3828_v40, %s3670_s24 }
  0x6a   : > { %763 = vrot.lane.b32.xlu1 %v3844_v46, %s3670_s24 }
  0x6b   : > { %761 = vrot.lane.b32.xlu0 %v3850_v48, %s3670_s24 }
  0x6e   : > { %767 = vrot.lane.b32.xlu1 %v3866_v54, %s3670_s24 }
  0x6f   : > { %765 = vrot.lane.b32.xlu0 %v3872_v56, %s3670_s24 }
  0x72   : > { %1362 = vrot.lane.b32.xlu1 %v556_v20, %s3669_s23  ;;  %v567_v20 = vrot.slane %v3756_v14, 2 }
  0x73   : > { %769 = vrot.lane.b32.xlu0 %v3894_v3, %s3670_s24 }
  0x74   : > { %v568_v15 = vsel %vm553_vm1, %v565_v6, %v567_v20  ;;  %v574_v6 = vrot.slane %v3806_v32, 2 }
  0x76   : > { %1458 = vrot.lane.b32.xlu1 %v3752_v12, %s3670_s24 }
  0x77   : > { %1364 = vrot.lane.b32.xlu0 %v558_v42, %s3669_s23  ;;  %v571_v42 = vsel %vm553_vm1, %v569_v11, %v570_v5  ;;  %v577_v5 = vrot.slane %v3803_v31, 2  ;;  %v580_v31 = vrot.slane %v3822_v38, 2 }
  0x79   : > { %v578_v32 = vsel %vm553_vm1, %v575_v23, %v577_v5 }
  0x7a   : > { %1554 = vrot.lane.b32.xlu1 %v561_v10, %s3671_s29 }
  0x7b   : > { %1460 = vrot.lane.b32.xlu0 %v3769_v17, %s3670_s24 }
  0x7e   : > { %1366 = vrot.lane.b32.xlu1 %v561_v10, %s3669_s23 }
  0x7f   : > { %1556 = vrot.lane.b32.xlu0 %v563_v0, %s3671_s29 }
  0x82   : > { %1462 = vrot.lane.b32.xlu1 %v3796_v28, %s3670_s24 }
  0x83   : > { %1368 = vrot.lane.b32.xlu0 %v563_v0, %s3669_s23 }
  0x86   : > { %1558 = vrot.lane.b32.xlu1 %v566_v7, %s3671_s29 }
  0x87   : > { %1464 = vrot.lane.b32.xlu0 %v3791_v25, %s3670_s24 }
  0x88   : > { %v4142_v61 = vpop.permute.xlu1 %649 }
  0x89   : > { %v4145_v2 = vpop.permute.xlu0 %645 }
  0x8a   : > { %1370 = vrot.lane.b32.xlu1 %v566_v7, %s3669_s23 }
  0x8b   : > { %1560 = vrot.lane.b32.xlu0 %v568_v15, %s3671_s29 }
  0x8c   : > { %v4151_v14 = vpop.permute.xlu1 %651 }
  0x8d   : > { %5768 = vst [vmem:[#allocation24_spill] sm:$0xff] %v4151_v14  ;;  %v4153_v13 = vpop.permute.xlu0 %647 }
  0x8e   : > { %1466 = vrot.lane.b32.xlu1 %v3818_v36, %s3670_s24 }
  0x8f   : > { %1372 = vrot.lane.b32.xlu0 %v568_v15, %s3669_s23  ;;  %v576_v15 = vsel %vm553_vm1, %v574_v6, %v575_v23 }
  0x90   : > { %v4159_v10 = vpop.permute.xlu1 %655 }
  0x91   : > { %5769 = vst [vmem:[#allocation25_spill] sm:$0xff] %v4159_v10  ;;  %v4162_v0 = vpop.permute.xlu0 %653 }
  0x92   : > { %1562 = vrot.lane.b32.xlu1 %v571_v42, %s3671_s29 }
  0x93   : > { %1468 = vrot.lane.b32.xlu0 %v3813_v33, %s3670_s24 }
  0x94   : > { %v4167_v22 = vpop.permute.xlu1 %659 }
  0x95   : > { %5770 = vst [vmem:[#allocation26_spill] sm:$0xff] %v4167_v22  ;;  %v4170_v1 = vpop.permute.xlu0 %657 }
  0x96   : > { %5771 = vst [vmem:[#allocation27_spill] sm:$0xff] %v4170_v1  ;;  %1374 = vrot.lane.b32.xlu1 %v571_v42, %s3669_s23 }
  0x97   : > { %1564 = vrot.lane.b32.xlu0 %v573_v24, %s3671_s29 }
  0x98   : > { %v4176_v7 = vpop.permute.xlu1 %663 }
  0x99   : > { %5772 = vst [vmem:[#allocation28_spill] sm:$0xff] %v4176_v7  ;;  %v4178_v20 = vpop.permute.xlu0 %661 }
  0x9a   : > { %5773 = vst [vmem:[#allocation29_spill] sm:$0xff] %v4178_v20  ;;  %1470 = vrot.lane.b32.xlu1 %v3840_v44, %s3670_s24  ;;  %v5815_v20 = vld [vmem:[#allocation15_spill] sm:$0xff] }
  0x9b   : > { %1376 = vrot.lane.b32.xlu0 %v573_v24, %s3669_s23  ;;  %v579_v24 = vrot.slane %v3828_v40, 2 }
  0x9c   : > { %v4184_v11 = vpop.permute.xlu1 %667 }
  0x9d   : > { %5774 = vst [vmem:[#allocation30_spill] sm:$0xff] %v4184_v11  ;;  %v4187_v42 = vpop.permute.xlu0 %665  ;;  %v581_v23 = vsel %vm553_vm1, %v579_v24, %v580_v31 }
  0x9e   : > { %5775 = vst [vmem:[#allocation31_spill] sm:$0xff] %v4187_v42  ;;  %1566 = vrot.lane.b32.xlu1 %v576_v15, %s3671_s29  ;;  %v5814_v42 = vld [vmem:[#allocation6_spill] sm:$0xff] }
  0x9f   : > { %1472 = vrot.lane.b32.xlu0 %v3835_v41, %s3670_s24 }
  0xa0   : > { %v4192_v30 = vpop.permute.xlu1 %671 }
  0xa1   : > { %5776 = vst [vmem:[#allocation32_spill] sm:$0xff] %v4192_v30  ;;  %v4195_v59 = vpop.permute.xlu0 %669 }
  0xa2   : > { %5777 = vst [vmem:[#allocation33_spill] sm:$0xff] %v4195_v59  ;;  %1378 = vrot.lane.b32.xlu1 %v576_v15, %s3669_s23  ;;  %v582_v15 = vrot.slane %v3825_v39, 2  ;;  %v585_v39 = vrot.slane %v3844_v46, 2  ;;  %v5808_v59 = vld [vmem:[#allocation10_spill] sm:$0xff] }
  0xa3   : > { %1568 = vrot.lane.b32.xlu0 %v578_v32, %s3671_s29 }
  0xa4   : > { %v4201_v6 = vpop.permute.xlu1 %675  ;;  %v583_v40 = vsel %vm553_vm1, %v580_v31, %v582_v15 }
  0xa5   : > { %5778 = vst [vmem:[#allocation34_spill] sm:$0xff] %v4201_v6  ;;  %v4203_v11 = vpop.permute.xlu0 %673 }
  0xa6   : > { %5779 = vst [vmem:[#allocation35_spill] sm:$0xff] %v4203_v11  ;;  %1474 = vrot.lane.b32.xlu1 %v3862_v52, %s3670_s24 }
  0xa7   : > { %1380 = vrot.lane.b32.xlu0 %v578_v32, %s3669_s23  ;;  %v584_v32 = vrot.slane %v3850_v48, 2 }
  0xa8   : > { %v4209_v5 = vpop.permute.xlu1 %679 }
  0xa9   : > { %5780 = vst [vmem:[#allocation36_spill] sm:$0xff] %v4209_v5  ;;  %v4212_v30 = vpop.permute.xlu0 %677  ;;  %v586_v31 = vsel %vm553_vm1, %v584_v32, %v585_v39 }
  0xaa   : > { %5781 = vst [vmem:[#allocation37_spill] sm:$0xff] %v4212_v30  ;;  %1570 = vrot.lane.b32.xlu1 %v581_v23, %s3671_s29 }
  0xab   : > { %1476 = vrot.lane.b32.xlu0 %v3857_v49, %s3670_s24 }
  0xac   : > { %v4217_v38 = vpop.permute.xlu1 %683 }
  0xad   : > { %5782 = vst [vmem:[#allocation38_spill] sm:$0xff] %v4217_v38  ;;  %v4220_v11 = vpop.permute.xlu0 %681 }
  0xae   : > { %5783 = vst [vmem:[#allocation39_spill] sm:$0xff] %v4220_v11  ;;  %1382 = vrot.lane.b32.xlu1 %v581_v23, %s3669_s23  ;;  %v587_v23 = vrot.slane %v3847_v47, 2  ;;  %v590_v47 = vrot.slane %v3866_v54, 2 }
  0xaf   : > { %1572 = vrot.lane.b32.xlu0 %v583_v40, %s3671_s29 }
  0xb0   : > { %v4226_v24 = vpop.permute.xlu1 %687  ;;  %v588_v48 = vsel %vm553_vm1, %v585_v39, %v587_v23 }
  0xb1   : > { %5784 = vst [vmem:[#allocation40_spill] sm:$0xff] %v4226_v24  ;;  %v4228_v30 = vpop.permute.xlu0 %685 }
  0xb2   : > { %5785 = vst [vmem:[#allocation41_spill] sm:$0xff] %v4228_v30  ;;  %1478 = vrot.lane.b32.xlu1 %v3884_v60, %s3670_s24 }
  0xb3   : > { %1384 = vrot.lane.b32.xlu0 %v583_v40, %s3669_s23  ;;  %v589_v40 = vrot.slane %v3872_v56, 2 }
  0xb4   : > { %v4234_v15 = vpop.permute.xlu1 %691 }
  0xb5   : > { %5786 = vst [vmem:[#allocation42_spill] sm:$0xff] %v4234_v15  ;;  %v4237_v11 = vpop.permute.xlu0 %689  ;;  %v591_v39 = vsel %vm553_vm1, %v589_v40, %v590_v47 }
  0xb6   : > { %5787 = vst [vmem:[#allocation43_spill] sm:$0xff] %v4237_v11  ;;  %1574 = vrot.lane.b32.xlu1 %v586_v31, %s3671_s29 }
  0xb7   : > { %1480 = vrot.lane.b32.xlu0 %v3879_v57, %s3670_s24 }
  0xb8   : > { %v4242_v46 = vpop.permute.xlu1 %695 }
  0xb9   : > { %5788 = vst [vmem:[#allocation44_spill] sm:$0xff] %v4242_v46  ;;  %v4245_v30 = vpop.permute.xlu0 %693 }
  0xba   : > { %5789 = vst [vmem:[#allocation45_spill] sm:$0xff] %v4245_v30  ;;  %1386 = vrot.lane.b32.xlu1 %v586_v31, %s3669_s23  ;;  %v592_v31 = vrot.slane %v3869_v55, 2  ;;  %v595_v55 = vrot.slane %v3888_v62, 2 }
  0xbb   : > { %1576 = vrot.lane.b32.xlu0 %v588_v48, %s3671_s29 }
  0xbc   : > { %v4251_v32 = vpop.permute.xlu1 %699  ;;  %v593_v56 = vsel %vm553_vm1, %v590_v47, %v592_v31 }
  0xbd   : > { %5790 = vst [vmem:[#allocation46_spill] sm:$0xff] %v4251_v32  ;;  %v4253_v11 = vpop.permute.xlu0 %697 }
  0xbe   : > { %5791 = vst [vmem:[#allocation47_spill] sm:$0xff] %v4253_v11  ;;  %1482 = vrot.lane.b32.xlu1 %v3906_v9, %s3670_s24 }
  0xbf   : > { %1388 = vrot.lane.b32.xlu0 %v588_v48, %s3669_s23  ;;  %v594_v48 = vrot.slane %v3894_v3, 2 }
  0xc0   : > { %v4259_v23 = vpop.permute.xlu1 %703 }
  0xc1   : > { %5792 = vst [vmem:[#allocation48_spill] sm:$0xff] %v4259_v23  ;;  %v4262_v30 = vpop.permute.xlu0 %701  ;;  %v596_v47 = vsel %vm553_vm1, %v594_v48, %v595_v55 }
  0xc2   : > { %5793 = vst [vmem:[#allocation49_spill] sm:$0xff] %v4262_v30  ;;  %1578 = vrot.lane.b32.xlu1 %v591_v39, %s3671_s29 }
  0xc3   : > { %1484 = vrot.lane.b32.xlu0 %v3901_v4, %s3670_s24 }
  0xc4   : > { %v4267_v54 = vpop.permute.xlu1 %707 }
  0xc5   : > { %5794 = vst [vmem:[#allocation50_spill] sm:$0xff] %v4267_v54  ;;  %v4270_v11 = vpop.permute.xlu0 %705 }
  0xc6   : > { %5795 = vst [vmem:[#allocation51_spill] sm:$0xff] %v4270_v11  ;;  %1390 = vrot.lane.b32.xlu1 %v591_v39, %s3669_s23  ;;  %v597_v39 = vrot.slane %v3891_v63, 2  ;;  %v600_v63 = vrot.slane %v3910_v18, 2 }
  0xc7   : > { %1580 = vrot.lane.b32.xlu0 %v593_v56, %s3671_s29 }
  0xc8   : > { %v4276_v40 = vpop.permute.xlu1 %743  ;;  %v598_v54 = vsel %vm553_vm1, %v595_v55, %v597_v39 }
  0xc9   : > { %v4278_v30 = vpop.permute.xlu0 %741 }
  0xca   : > { %1486 = vrot.lane.b32.xlu1 %v3928_v34, %s3670_s24 }
  0xcb   : > { %1392 = vrot.lane.b32.xlu0 %v593_v56, %s3669_s23  ;;  %v599_v56 = vrot.slane %v3916_v21, 2 }
  0xcc   : > { %v4284_v31 = vpop.permute.xlu1 %747 }
  0xcd   : > { %5796 = vst [vmem:[#allocation52_spill] sm:$0xff] %v4284_v31  ;;  %v4287_v11 = vpop.permute.xlu0 %745  ;;  %v601_v55 = vsel %vm553_vm1, %v599_v56, %v600_v63  ;;  %v5824_v31 = vld [vmem:[#allocation19_spill] sm:$0xff] }
  0xce   : > { %1582 = vrot.lane.b32.xlu1 %v596_v47, %s3671_s29 }
  0xcf   : > { %1488 = vrot.lane.b32.xlu0 %v3923_v26, %s3670_s24 }
  0xd0   : > { %v4292_v3 = vpop.permute.xlu1 %751 }
  0xd1   : > { %5797 = vst [vmem:[#allocation53_spill] sm:$0xff] %v4292_v3  ;;  %v4295_v23 = vpop.permute.xlu0 %749 }
  0xd2   : > { %5798 = vst [vmem:[#allocation54_spill] sm:$0xff] %v4295_v23  ;;  %1394 = vrot.lane.b32.xlu1 %v596_v47, %s3669_s23  ;;  %v602_v47 = vrot.slane %v3913_v19, 2  ;;  %v5805_v19 = vld [vmem:[#allocation4_spill] sm:$0xff] }
  0xd3   : > { %1584 = vrot.lane.b32.xlu0 %v598_v54, %s3671_s29  ;;  %v605_v56 = vrot.slane %v5805_v19, 2 }
  0xd4   : > { %v4301_v48 = vpop.permute.xlu1 %755  ;;  %v603_v24 = vsel %vm553_vm1, %v600_v63, %v602_v47 }
  0xd5   : > { %5799 = vst [vmem:[#allocation55_spill] sm:$0xff] %v4301_v48  ;;  %v4303_v32 = vpop.permute.xlu0 %753  ;;  %v610_v48 = vrot.slane %v5814_v42, 2 }
  0xd6   : > { %5800 = vst [vmem:[#allocation56_spill] sm:$0xff] %v4303_v32  ;;  %1490 = vrot.lane.b32.xlu1 %v3950_v53, %s3670_s24  ;;  %v5817_v32 = vld [vmem:[#allocation7_spill] sm:$0xff] }
  0xd7   : > { %1396 = vrot.lane.b32.xlu0 %v598_v54, %s3669_s23  ;;  %v604_v54 = vrot.slane %v3938_v43, 2  ;;  %v612_v10 = vrot.slane %v5817_v32, 2  ;;  %v5819_v32 = vld [vmem:[#allocation13_spill] sm:$0xff] }
  0xd8   : > { %v4309_v39 = vpop.permute.xlu1 %759 }
  0xd9   : > { %5801 = vst [vmem:[#allocation57_spill] sm:$0xff] %v4309_v39  ;;  %v4312_v46 = vpop.permute.xlu0 %757  ;;  %v606_v63 = vsel %vm553_vm1, %v604_v54, %v605_v56 }
  0xda   : > { %5802 = vst [vmem:[#allocation58_spill] sm:$0xff] %v4312_v46  ;;  %1586 = vrot.lane.b32.xlu1 %v601_v55, %s3671_s29 }
  0xdb   : > { %1492 = vrot.lane.b32.xlu0 %v3945_v45, %s3670_s24 }
  0xdc   : > { %v4317_v15 = vpop.permute.xlu1 %763 }
  0xdd   : > { %5803 = vst [vmem:[#allocation59_spill] sm:$0xff] %v4317_v15  ;;  %v4320_v38 = vpop.permute.xlu0 %761  ;;  %v5809_v15 = vld [vmem:[#allocation5_spill] sm:$0xff] }
  0xde   : > { %5804 = vst [vmem:[#allocation60_spill] sm:$0xff] %v4320_v38  ;;  %1398 = vrot.lane.b32.xlu1 %v601_v55, %s3669_s23  ;;  %v607_v55 = vrot.slane %v5809_v15, 2  ;;  %v5811_v38 = vld [vmem:[#allocation9_spill] sm:$0xff]  ;;  %v5813_v15 = vld [vmem:[#allocation8_spill] sm:$0xff] }
  0xdf   : > { %1588 = vrot.lane.b32.xlu0 %v603_v24, %s3671_s29 }
  0xe0   : > { %v4326_v5 = vpop.permute.xlu1 %767 }
  0xe1   : > { %5806 = vst [vmem:[#allocation4_spill] sm:$0xff] %v4326_v5  ;;  %v4328_v6 = vpop.permute.xlu0 %765 }
  0xe2   : > { %5807 = vst [vmem:[#allocation61_spill] sm:$0xff] %v4328_v6  ;;  %1494 = vrot.lane.b32.xlu1 %v5808_v59, %s3670_s24  ;;  %v608_v6 = vsel %vm553_vm1, %v605_v56, %v607_v55 }
  0xe3   : > { %1400 = vrot.lane.b32.xlu0 %v603_v24, %s3669_s23  ;;  %v5812_v24 = vld [vmem:[#allocation2_spill] sm:$0xff] }
  0xe4   : > { %v1363_v47 = vpop.permute.xlu1 %1362 }
  0xe5   : > { %v4335_v39 = vpop.permute.xlu0 %769  ;;  %v1650_v54 = vsel %vm933_vm2, %v5812_v24, %v1363_v47  ;;  %v5816_v47 = vld [vmem:[#allocation3_spill] sm:$0xff] }
  0xe6   : > { %5810 = vst [vmem:[#allocation10_spill] sm:$0xff] %v4335_v39  ;;  %1590 = vrot.lane.b32.xlu1 %v606_v63, %s3671_s29  ;;  %v609_v39 = vrot.slane %v5813_v15, 2 }
  0xe7   : > { %1496 = vrot.lane.b32.xlu0 %v5811_v38, %s3670_s24 }
  0xe8   : > { %v1459_v5 = vpop.permute.xlu1 %1458 }
  0xe9   : > { %v1365_v7 = vpop.permute.xlu0 %1364  ;;  %v1682_v46 = vsel %vm966_vm3, %v1650_v54, %v1459_v5 }
  0xea   : > { %1402 = vrot.lane.b32.xlu1 %v606_v63, %s3669_s23  ;;  %v611_v63 = vsel %vm553_vm1, %v609_v39, %v610_v48  ;;  %v1651_v24 = vsel %vm933_vm2, %v5816_v47, %v1365_v7  ;;  %v613_v39 = vsel %vm553_vm1, %v610_v48, %v612_v10  ;;  %v5820_v47 = vld [vmem:[#allocation11_spill] sm:$0xff] }
  0xeb   : > { %1592 = vrot.lane.b32.xlu0 %v608_v6, %s3671_s29 }
  0xec   : > { %v1555_v22 = vpop.permute.xlu1 %1554 }
  0xed   : > { %v1461_v56 = vpop.permute.xlu0 %1460  ;;  %v1714_v55 = vsel %vm999_vm4, %v1682_v46, %v1555_v22  ;;  %v5818_v46 = vld [vmem:[#allocation14_spill] sm:$0xff] }
  0xee   : > { %1498 = vrot.lane.b32.xlu1 %v5815_v20, %s3670_s24  ;;  %3428 = vmatprep.mubr.msk.f32.mxu1 %vm1040_vm5, %v1714_v55  ;;  %v1683_v5 = vsel %vm966_vm3, %v1651_v24, %v1461_v56  ;;  %v614_v56 = vrot.slane %v5819_v32, 2  ;;  %v615_v24 = vrot.slane %v5820_v47, 2 }
  0xef   : > { %1404 = vrot.lane.b32.xlu0 %v608_v6, %s3669_s23 }
  0xf0   : > { %v1367_v3 = vpop.permute.xlu1 %1366  ;;  %v616_v10 = vsel %vm553_vm1, %v614_v56, %v615_v24 }
  0xf1   : > { %v1557_v54 = vpop.permute.xlu0 %1556  ;;  %v1652_v7 = vsel %vm933_vm2, %v3752_v12, %v1367_v3 }
  0xf2   : > { %v1715_v22 = vsel %vm999_vm4, %v1683_v5, %v1557_v54  ;;  %1594 = vrot.lane.b32.xlu1 %v611_v63, %s3671_s29 }
  0xf3   : > { %1500 = vrot.lane.b32.xlu0 %v5818_v46, %s3670_s24  ;;  %3429 = vmatmul.mubr.msk.f32.vlgmr.msra.gmra.mxu1 %vm1040_vm5, %v1715_v22 }
  0xf4   : > { %v1463_v6 = vpop.permute.xlu1 %1462 }
  0xf5   : > { %v1369_v55 = vpop.permute.xlu0 %1368  ;;  %v1684_v5 = vsel %vm966_vm3, %v1652_v7, %v1463_v6 }
  0xf6   : > { %1406 = vrot.lane.b32.xlu1 %v611_v63, %s3669_s23  ;;  %v1653_v3 = vsel %vm933_vm2, %v3769_v17, %v1369_v55  ;;  %v5822_v63 = vld [vmem:[#allocation12_spill] sm:$0xff] }
  0xf7   : > { %1596 = vrot.lane.b32.xlu0 %v613_v39, %s3671_s29  ;;  %v617_v6 = vrot.slane %v5822_v63, 2 }
  0xf8   : > { %v1559_v54 = vpop.permute.xlu1 %1558 }
  0xf9   : > { %v4372_v22 = vsel %vm999_vm4, %v1684_v5, %v1559_v54  ;;  %v1465_v1 = vpop.permute.xlu0 %1464  ;;  %v618_v55 = vsel %vm553_vm1, %v615_v24, %v617_v6  ;;  %v5828_v6 = vld [vmem:[#allocation17_spill] sm:$0xff] }
  0xfa   : > { %5821 = vst [vmem:[#allocation5_spill] sm:$0xff] %v4372_v22  ;;  %1502 = vrot.lane.b32.xlu1 %v4016_v16, %s3670_s24  ;;  %3431 = vmatprep.mubr.msk.f32.mxu1 %vm1040_vm5, %v4372_v22  ;;  %v1685_v7 = vsel %vm966_vm3, %v1653_v3, %v1465_v1  ;;  %v5825_v3 = vld [vmem:[#allocation18_spill] sm:$0xff] }
  0xfb   : > { %1408 = vrot.lane.b32.xlu0 %v613_v39, %s3669_s23  ;;  %v619_v63 = vrot.slane %v5825_v3, 2 }
  0xfc   : > { %v1371_v48 = vpop.permute.xlu1 %1370 }
  0xfd   : > { %v1561_v5 = vpop.permute.xlu0 %1560  ;;  %v1654_v1 = vsel %vm933_vm2, %v3796_v28, %v1371_v48 }
  0xfe   : > { %v4385_v54 = vsel %vm999_vm4, %v1685_v7, %v1561_v5  ;;  %1598 = vrot.lane.b32.xlu1 %v616_v10, %s3671_s29  ;;  %v5826_v7 = vld [vmem:[#allocation16_spill] sm:$0xff] }
  0xff   : > { %5823 = vst [vmem:[#allocation9_spill] sm:$0xff] %v4385_v54  ;;  %1504 = vrot.lane.b32.xlu0 %v5824_v31, %s3670_s24  ;;  %3432 = vmatmul.mubr.msk.f32.gmra.mxu1 %vm1040_vm5, %v4385_v54  ;;  %v620_v5 = vrot.slane %v5826_v7, 2 }
 0x100   : > { %v1467_v39 = vpop.permute.xlu1 %1466 }
 0x101   : > { %v1373_v56 = vpop.permute.xlu0 %1372  ;;  %v1686_v22 = vsel %vm966_vm3, %v1654_v1, %v1467_v39  ;;  %v621_v24 = vsel %vm553_vm1, %v619_v63, %v620_v5  ;;  %v622_v39 = vrot.slane %v5828_v6, 2  ;;  %v5830_v63 = vld [vmem:[#allocation22_spill] sm:$0xff] }
 0x102   : > { %1410 = vrot.lane.b32.xlu1 %v616_v10, %s3669_s23  ;;  %v1655_v10 = vsel %vm933_vm2, %v3791_v25, %v1373_v56  ;;  %v624_v7 = vrot.slane %v5830_v63, 2 }
 0x103   : > { %1600 = vrot.lane.b32.xlu0 %v618_v55, %s3671_s29  ;;  %v623_v56 = vsel %vm553_vm1, %v620_v5, %v622_v39  ;;  %v5832_v39 = vld [vmem:[#allocation21_spill] sm:$0xff] }
 0x104   : > { %v1563_v23 = vpop.permute.xlu1 %1562 }
 0x105   : > { %v4401_v54 = vsel %vm999_vm4, %v1686_v22, %v1563_v23  ;;  %v1469_v14 = vpop.permute.xlu0 %1468 }
 0x106   : > { %5827 = vst [vmem:[#allocation2_spill] sm:$0xff] %v4401_v54  ;;  %1506 = vrot.lane.b32.xlu1 %v4038_v8, %s3670_s24  ;;  %3434 = vmatprep.mubr.msk.f32.mxu1 %vm1040_vm5, %v4401_v54  ;;  %v1687_v23 = vsel %vm966_vm3, %v1655_v10, %v1469_v14  ;;  %v5831_v10 = vld [vmem:[#allocation20_spill] sm:$0xff] }
 0x107   : > { %1412 = vrot.lane.b32.xlu0 %v618_v55, %s3669_s23  ;;  %v625_v6 = vrot.slane %v5831_v10, 2 }
 0x108   : > { %v1375_v48 = vpop.permute.xlu1 %1374 }
 0x109   : > { %v1565_v22 = vpop.permute.xlu0 %1564  ;;  %v1656_v14 = vsel %vm933_vm2, %v3818_v36, %v1375_v48  ;;  %v626_v5 = vsel %vm553_vm1, %v624_v7, %v625_v6 }
 0x10a   : > { %v4414_v1 = vsel %vm999_vm4, %v1687_v23, %v1565_v22  ;;  %1602 = vrot.lane.b32.xlu1 %v621_v24, %s3671_s29 }
 0x10b   : > { %5829 = vst [vmem:[#allocation8_spill] sm:$0xff] %v4414_v1  ;;  %1508 = vrot.lane.b32.xlu0 %v4033_v58, %s3670_s24  ;;  %3435 = vmatmul.mubr.msk.f32.gmra.mxu1 %vm1040_vm5, %v4414_v1 }
 0x10c   : > { %v1471_v55 = vpop.permute.xlu1 %1470 }
 0x10d   : > { %v1377_v3 = vpop.permute.xlu0 %1376  ;;  %v1688_v23 = vsel %vm966_vm3, %v1656_v14, %v1471_v55  ;;  %v627_v55 = vrot.slane %v5832_v39, 2  ;;  %v630_v39 = vrot.slane %v4042_v29, 2 }
 0x10e   : > { %1414 = vrot.lane.b32.xlu1 %v621_v24, %s3669_s23  ;;  %v1657_v24 = vsel %vm933_vm2, %v3813_v33, %v1377_v3 }
 0x10f   : > { %1604 = vrot.lane.b32.xlu0 %v623_v56, %s3671_s29  ;;  %v628_v7 = vsel %vm553_vm1, %v625_v6, %v627_v55  ;;  %v1032_v6 = vld [vmem:[%s5702_s2] sm:$0xff] }
 0x110   : > { %v1567_v22 = vpop.permute.xlu1 %1566 }
 0x111   : > { %v4430_v1 = vsel %vm999_vm4, %v1688_v23, %v1567_v22  ;;  %v1473_v54 = vpop.permute.xlu0 %1472  ;;  %v1033_v23 = vld [vmem:[%s5702_s2 + $0x8] sm:$0xff] }
 0x112   : > { %1510 = vrot.lane.b32.xlu1 %v4060_v51, %s3670_s24  ;;  %3437 = vmatprep.mubr.msk.f32.mxu1 %vm1040_vm5, %v4430_v1  ;;  %v1689_v14 = vsel %vm966_vm3, %v1657_v24, %v1473_v54  ;;  %v629_v24 = vrot.slane %v4048_v27, 2 }
 0x113   : > { %1416 = vrot.lane.b32.xlu0 %v623_v56, %s3669_s23  ;;  %v3198_v56 = vld [vmem:[%s5702_s2 + $0x38] sm:$0xff]  ;;  %3372 = vmatprep.subr.mxu0 %v1033_v23 }
 0x114   : > { %v1379_v48 = vpop.permute.xlu1 %1378  ;;  %3528 = vmatprep.subr.mxu1 %v3198_v56  ;;  %3373 = vmatpush3.msra.mxu0 %v1033_v23  ;;  %v631_v29 = vsel %vm553_vm1, %v629_v24, %v630_v39  ;;  %v4497_v24 = vld [vmem:[%s4485_s13] sm:$0xff] }
 0x115   : > { %v1569_v63 = vpop.permute.xlu0 %1568  ;;  %3529 = vmatpush3.msra.mxu1 %v3198_v56  ;;  %v1658_v22 = vsel %vm933_vm2, %v3840_v44, %v1379_v48  ;;  %3374 = vmatprep.subr.mxu0 %v1032_v6  ;;  %v632_v56 = vrot.slane %v4045_v37, 2 }
 0x116   : > { %v4443_v10 = vsel %vm999_vm4, %v1689_v14, %v1569_v63  ;;  %1606 = vrot.lane.b32.xlu1 %v626_v5, %s3671_s29  ;;  %3375 = vmatpush3.msra.mxu0 %v1032_v6  ;;  %v4500_v6 = vld [vmem:[%s4485_s13 + $0x8] sm:$0xff] }
 0x117   : > { %5833 = vst [vmem:[#allocation6_spill] sm:$0xff] %v4443_v10  ;;  %1512 = vrot.lane.b32.xlu0 %v4055_v35, %s3670_s24  ;;  %3438 = vmatmul.mubr.msk.f32.gmra.mxu1 %vm1040_vm5, %v4443_v10 }
 0x118   : > { %v1475_v3 = vpop.permute.xlu1 %1474 }
 0x119   : > { %v1381_v54 = vpop.permute.xlu0 %1380 }
 0x11a   : > { %1418 = vrot.lane.b32.xlu1 %v626_v5, %s3669_s23  ;;  %v1690_v5 = vsel %vm966_vm3, %v1658_v22, %v1475_v3  ;;  %v1659_v27 = vsel %vm933_vm2, %v3835_v41, %v1381_v54  ;;  %v5836_v54 = vld [vmem:[#allocation23_spill] sm:$0xff]  ;;  %v633_v22 = vsel %vm553_vm1, %v630_v39, %v632_v56 }
 0x11b   : > { %1608 = vrot.lane.b32.xlu0 %v628_v7, %s3671_s29 }
 0x11c   : > { %v1571_v55 = vpop.permute.xlu1 %1570 }
 0x11d   : > { %v4468_v14 = vsel %vm999_vm4, %v1690_v5, %v1571_v55  ;;  %v1477_v63 = vpop.permute.xlu0 %1476 }
 0x11e   : > { %5834 = vst [vmem:[#allocation15_spill] sm:$0xff] %v4468_v14  ;;  %1514 = vrot.lane.b32.xlu1 %v4071_v50, %s3670_s24  ;;  %3440 = vmatprep.mubr.msk.f32.mxu1 %vm1040_vm5, %v4468_v14  ;;  %v1691_v3 = vsel %vm966_vm3, %v1659_v27, %v1477_v63  ;;  %v509_v63 = vrot.slane %v4497_v24, 1  ;;  %v510_v27 = vrot.slane %v4500_v6, 1 }
 0x11f   : > { %1420 = vrot.lane.b32.xlu0 %v628_v7, %s3669_s23 }
 0x120   : > { %v1383_v48 = vpop.permute.xlu1 %1382 }
 0x121   : > { %v1573_v23 = vpop.permute.xlu0 %1572  ;;  %v1660_v55 = vsel %vm933_vm2, %v3862_v52, %v1383_v48  ;;  %v634_v48 = vrot.slane %v4497_v24, 2 }
 0x122   : > { %v4488_v7 = vsel %vm999_vm4, %v1691_v3, %v1573_v23  ;;  %1610 = vrot.lane.b32.xlu1 %v631_v29, %s3671_s29 }
 0x123   : > { %5835 = vst [vmem:[#allocation3_spill] sm:$0xff] %v4488_v7  ;;  %1516 = vrot.lane.b32.xlu0 %v5836_v54, %s3670_s24  ;;  %3441 = vmatmul.mubr.msk.f32.gmra.mxu1 %vm1040_vm5, %v4488_v7  ;;  %v370_v7 = vld [vmem:[%s4485_s13 + $0x10] sm:$0x3] }
 0x124   : > { %v1479_v37 = vpop.permute.xlu1 %1478 }
 0x125   : > { %v1385_v5 = vpop.permute.xlu0 %1384  ;;  %v1692_v3 = vsel %vm966_vm3, %v1660_v55, %v1479_v37  ;;  %v635_v37 = vrot.slane %v4500_v6, 2 }
 0x126   : > { %837 = vrot.lane.b32.xlu1 %v3752_v12, %s3671_s29  ;;  %v4520_v12 = vsel %vm428_vm0, %v509_v63, %v510_v27  ;;  %v1661_v55 = vsel %vm933_vm2, %v3857_v49, %v1385_v5 }
 0x127   : > { %1612 = vrot.lane.b32.xlu0 %v633_v22, %s3671_s29  ;;  %v4539_v5 = vsel %vm553_vm1, %v634_v48, %v635_v37 }
 0x128   : > { %v1575_v39 = vpop.permute.xlu1 %1574 }
 0x129   : > { %v4511_v56 = vsel %vm999_vm4, %v1692_v3, %v1575_v39  ;;  %v1481_v23 = vpop.permute.xlu0 %1480  ;;  %v512_v39 = vrot.slane %v370_v7, 1 }
 0x12a   : > { %5837 = vst [vmem:[#allocation7_spill] sm:$0xff] %v4511_v56  ;;  %839 = vrot.lane.b32.xlu1 %v3769_v17, %s3671_s29  ;;  %3443 = vmatprep.mubr.msk.f32.mxu1 %vm1040_vm5, %v4511_v56  ;;  %v3197_v17 = vld [vmem:[%s5702_s2 + $0x30] sm:$0xff]  ;;  %v1693_v56 = vsel %vm966_vm3, %v1661_v55, %v1481_v23  ;;  %v637_v55 = vrot.slane %v370_v7, 2 }
 0x12b   : > { %1422 = vrot.lane.b32.xlu0 %v631_v29, %s3669_s23  ;;  %3530 = vmatprep.subr.mxu1 %v3197_v17  ;;  %v4542_v23 = vsel %vm428_vm0, %v510_v27, %v512_v39 }
 0x12c   : > { %v1387_v3 = vpop.permute.xlu1 %1386  ;;  %3531 = vmatpush3.msra.mxu1 %v3197_v17  ;;  %v4552_v48 = vsel %vm553_vm1, %v635_v37, %v637_v55 }
 0x12d   : > { %v1577_v14 = vpop.permute.xlu0 %1576 }
 0x12e   : > { %v4531_v29 = vsel %vm999_vm4, %v1693_v56, %v1577_v14  ;;  %1518 = vrot.lane.b32.xlu1 %v4520_v12, %s3670_s24  ;;  %v1662_v14 = vsel %vm933_vm2, %v3884_v60, %v1387_v3 }
 0x12f   : > { %1424 = vrot.lane.b32.xlu0 %v633_v22, %s3669_s23  ;;  %3444 = vmatmul.mubr.msk.f32.gmra.mxu1 %vm1040_vm5, %v4531_v29 }
 0x130   : > { %v1483_v63 = vpop.permute.xlu1 %1482 }
 0x131   : > { %v1389_v10 = vpop.permute.xlu0 %1388  ;;  %v1694_v22 = vsel %vm966_vm3, %v1662_v14, %v1483_v63 }
 0x132   : > { %1614 = vrot.lane.b32.xlu1 %v4539_v5, %s3671_s29  ;;  %v1663_v3 = vsel %vm933_vm2, %v3879_v57, %v1389_v10 }
 0x133   : > { %1520 = vrot.lane.b32.xlu0 %v4542_v23, %s3670_s24 }
 0x134   : > { %v1579_v56 = vpop.permute.xlu1 %1578 }
 0x135   : > { %v4555_v27 = vsel %vm999_vm4, %v1694_v22, %v1579_v56  ;;  %v1485_v7 = vpop.permute.xlu0 %1484 }
 0x136   : > { %841 = vrot.lane.b32.xlu1 %v3796_v28, %s3671_s29  ;;  %3446 = vmatprep.mubr.msk.f32.mxu1 %vm1040_vm5, %v4555_v27  ;;  %v1695_v37 = vsel %vm966_vm3, %v1663_v3, %v1485_v7 }
 0x137   : > { %1616 = vrot.lane.b32.xlu0 %v4552_v48, %s3671_s29 }
 0x138   : > { %v1391_v39 = vpop.permute.xlu1 %1390 }
 0x139   : > { %v1581_v17 = vpop.permute.xlu0 %1580  ;;  %v1664_v10 = vsel %vm933_vm2, %v3906_v9, %v1391_v39 }
 0x13a   : > { %v4567_v63 = vsel %vm999_vm4, %v1695_v37, %v1581_v17  ;;  %845 = vrot.lane.b32.xlu1 %v3818_v36, %s3671_s29 }
 0x13b   : > { %843 = vrot.lane.b32.xlu0 %v3791_v25, %s3671_s29  ;;  %3447 = vmatmul.mubr.msk.f32.gmra.mxu1 %vm1040_vm5, %v4567_v63 }
 0x13c   : > { %v1487_v28 = vpop.permute.xlu1 %1486 }
 0x13d   : > { %v1393_v55 = vpop.permute.xlu0 %1392  ;;  %v1696_v14 = vsel %vm966_vm3, %v1664_v10, %v1487_v28 }
 0x13e   : > { %849 = vrot.lane.b32.xlu1 %v3840_v44, %s3671_s29  ;;  %v1665_v44 = vsel %vm933_vm2, %v3901_v4, %v1393_v55 }
 0x13f   : > { %847 = vrot.lane.b32.xlu0 %v3813_v33, %s3671_s29 }
 0x140   : > { %v1583_v36 = vpop.permute.xlu1 %1582 }
 0x141   : > { %v4583_v22 = vsel %vm999_vm4, %v1696_v14, %v1583_v36  ;;  %v1489_v25 = vpop.permute.xlu0 %1488 }
 0x142   : > { %853 = vrot.lane.b32.xlu1 %v3862_v52, %s3671_s29  ;;  %3449 = vmatprep.mubr.msk.f32.mxu1 %vm1040_vm5, %v4583_v22  ;;  %v1697_v56 = vsel %vm966_vm3, %v1665_v44, %v1489_v25 }
 0x143   : > { %851 = vrot.lane.b32.xlu0 %v3835_v41, %s3671_s29 }
 0x144   : > { %v1395_v33 = vpop.permute.xlu1 %1394 }
 0x145   : > { %v1585_v7 = vpop.permute.xlu0 %1584  ;;  %v1666_v39 = vsel %vm933_vm2, %v3928_v34, %v1395_v33 }
 0x146   : > { %v4595_v3 = vsel %vm999_vm4, %v1697_v56, %v1585_v7  ;;  %857 = vrot.lane.b32.xlu1 %v3884_v60, %s3671_s29 }
 0x147   : > { %855 = vrot.lane.b32.xlu0 %v3857_v49, %s3671_s29  ;;  %3450 = vmatmul.mubr.msk.f32.gmra.mxu1 %vm1040_vm5, %v4595_v3 }
 0x148   : > { %v1491_v41 = vpop.permute.xlu1 %1490 }
 0x149   : > { %v1397_v52 = vpop.permute.xlu0 %1396  ;;  %v1698_v37 = vsel %vm966_vm3, %v1666_v39, %v1491_v41 }
 0x14a   : > { %861 = vrot.lane.b32.xlu1 %v3906_v9, %s3671_s29  ;;  %v1667_v9 = vsel %vm933_vm2, %v3923_v26, %v1397_v52 }
 0x14b   : > { %859 = vrot.lane.b32.xlu0 %v3879_v57, %s3671_s29 }
 0x14c   : > { %v1587_v60 = vpop.permute.xlu1 %1586 }
 0x14d   : > { %v4611_v17 = vsel %vm999_vm4, %v1698_v37, %v1587_v60  ;;  %v1493_v49 = vpop.permute.xlu0 %1492 }
 0x14e   : > { %771 = vrot.lane.b32.xlu1 %v3888_v62, %s3670_s24  ;;  %3452 = vmatprep.mubr.msk.f32.mxu1 %vm1040_vm5, %v4611_v17  ;;  %v1699_v28 = vsel %vm966_vm3, %v1667_v9, %v1493_v49 }
 0x14f   : > { %863 = vrot.lane.b32.xlu0 %v3901_v4, %s3671_s29 }
 0x150   : > { %v1399_v57 = vpop.permute.xlu1 %1398 }
 0x151   : > { %v1589_v55 = vpop.permute.xlu0 %1588  ;;  %v1668_v14 = vsel %vm933_vm2, %v3950_v53, %v1399_v57 }
 0x152   : > { %v4623_v10 = vsel %vm999_vm4, %v1699_v28, %v1589_v55  ;;  %867 = vrot.lane.b32.xlu1 %v3923_v26, %s3671_s29 }
 0x153   : > { %865 = vrot.lane.b32.xlu0 %v3928_v34, %s3671_s29  ;;  %3453 = vmatmul.mubr.msk.f32.gmra.mxu1 %vm1040_vm5, %v4623_v10 }
 0x154   : > { %v1495_v62 = vpop.permute.xlu1 %1494 }
 0x155   : > { %v1401_v4 = vpop.permute.xlu0 %1400  ;;  %v1700_v36 = vsel %vm966_vm3, %v1668_v14, %v1495_v62  ;;  %v4710_v14 = vld [vmem:[%s3723_s22 + $0x140] sm:$0xff] }
 0x156   : > { %775 = vrot.lane.b32.xlu1 %v3910_v18, %s3670_s24  ;;  %v1669_v18 = vsel %vm933_vm2, %v3945_v45, %v1401_v4 }
 0x157   : > { %773 = vrot.lane.b32.xlu0 %v3916_v21, %s3670_s24 }
 0x158   : > { %v1591_v26 = vpop.permute.xlu1 %1590 }
 0x159   : > { %v4639_v25 = vsel %vm999_vm4, %v1700_v36, %v1591_v26  ;;  %v1497_v34 = vpop.permute.xlu0 %1496  ;;  %v4715_v36 = vld [vmem:[%s3723_s22 + $0x138] sm:$0xff] }
 0x15a   : > { %871 = vrot.lane.b32.xlu1 %v3945_v45, %s3671_s29  ;;  %3455 = vmatprep.mubr.msk.f32.mxu1 %vm1040_vm5, %v4639_v25  ;;  %v1701_v44 = vsel %vm966_vm3, %v1669_v18, %v1497_v34 }
 0x15b   : > { %869 = vrot.lane.b32.xlu0 %v3950_v53, %s3671_s29 }
 0x15c   : > { %v1403_v21 = vpop.permute.xlu1 %1402 }
 0x15d   : > { %v1593_v33 = vpop.permute.xlu0 %1592  ;;  %v1670_v45 = vsel %vm933_vm2, %v5808_v59, %v1403_v21 }
 0x15e   : > { %v4651_v56 = vsel %vm999_vm4, %v1701_v44, %v1593_v33  ;;  %779 = vrot.lane.b32.xlu1 %v5805_v19, %s3670_s24 }
 0x15f   : > { %777 = vrot.lane.b32.xlu0 %v3938_v43, %s3670_s24  ;;  %3456 = vmatmul.mubr.msk.f32.gmra.mxu1 %vm1040_vm5, %v4651_v56 }
 0x160   : > { %v1499_v53 = vpop.permute.xlu1 %1498 }
 0x161   : > { %v1405_v7 = vpop.permute.xlu0 %1404  ;;  %v1702_v41 = vsel %vm966_vm3, %v1670_v45, %v1499_v53  ;;  %v4732_v53 = vld [vmem:[%s3723_s22 + $0x158] sm:$0xff] }
 0x162   : > { %875 = vrot.lane.b32.xlu1 %v5811_v38, %s3671_s29  ;;  %v1671_v39 = vsel %vm933_vm2, %v5811_v38, %v1405_v7 }
 0x163   : > { %873 = vrot.lane.b32.xlu0 %v5808_v59, %s3671_s29 }
 0x164   : > { %v1595_v19 = vpop.permute.xlu1 %1594 }
 0x165   : > { %v4667_v52 = vsel %vm999_vm4, %v1702_v41, %v1595_v19  ;;  %v1501_v43 = vpop.permute.xlu0 %1500 }
 0x166   : > { %783 = vrot.lane.b32.xlu1 %v5814_v42, %s3670_s24  ;;  %3458 = vmatprep.mubr.msk.f32.mxu1 %vm1040_vm5, %v4667_v52  ;;  %v1703_v37 = vsel %vm966_vm3, %v1671_v39, %v1501_v43 }
 0x167   : > { %781 = vrot.lane.b32.xlu0 %v5813_v15, %s3670_s24 }
 0x168   : > { %v1407_v59 = vpop.permute.xlu1 %1406 }
 0x169   : > { %v1597_v60 = vpop.permute.xlu0 %1596  ;;  %v1672_v38 = vsel %vm933_vm2, %v5815_v20, %v1407_v59 }
 0x16a   : > { %v4679_v49 = vsel %vm999_vm4, %v1703_v37, %v1597_v60  ;;  %879 = vrot.lane.b32.xlu1 %v5818_v46, %s3671_s29  ;;  %v4756_v37 = vld [vmem:[%s3723_s22 + $0x170] sm:$0xff]  ;;  %v4763_v60 = vld [vmem:[%s3723_s22 + $0x168] sm:$0xff] }
 0x16b   : > { %877 = vrot.lane.b32.xlu0 %v5815_v20, %s3671_s29  ;;  %3459 = vmatmul.mubr.msk.f32.gmra.mxu1 %vm1040_vm5, %v4679_v49 }
 0x16c   : > { %v1503_v42 = vpop.permute.xlu1 %1502 }
 0x16d   : > { %v1409_v15 = vpop.permute.xlu0 %1408  ;;  %v1704_v9 = vsel %vm966_vm3, %v1672_v38, %v1503_v42  ;;  %v3164_v38 = vld [vmem:[%s5702_s2 + $0x28] sm:$0xff] }
 0x16e   : > { %787 = vrot.lane.b32.xlu1 %v5820_v47, %s3670_s24  ;;  %v1673_v20 = vsel %vm933_vm2, %v5818_v46, %v1409_v15  ;;  %3476 = vmatprep.subr.mxu0 %v3164_v38 }
 0x16f   : > { %785 = vrot.lane.b32.xlu0 %v5819_v32, %s3670_s24 }
 0x170   : > { %v1599_v57 = vpop.permute.xlu1 %1598 }
 0x171   : > { %v4695_v28 = vsel %vm999_vm4, %v1704_v9, %v1599_v57  ;;  %v1505_v55 = vpop.permute.xlu0 %1504 }
 0x172   : > { %883 = vrot.lane.b32.xlu1 %v5824_v31, %s3671_s29  ;;  %3461 = vmatprep.mubr.msk.f32.mxu1 %vm1040_vm5, %v4695_v28  ;;  %v1705_v47 = vsel %vm966_vm3, %v1673_v20, %v1505_v55 }
 0x173   : > { %881 = vrot.lane.b32.xlu0 %v4016_v16, %s3671_s29 }
 0x174   : > { %v1411_v32 = vpop.permute.xlu1 %1410 }
 0x175   : > { %v1601_v62 = vpop.permute.xlu0 %1600  ;;  %v1674_v34 = vsel %vm933_vm2, %v4016_v16, %v1411_v32  ;;  %v4739_v16 = vld [vmem:[%s3723_s22 + $0x150] sm:$0xff] }
 0x176   : > { %v4707_v4 = vsel %vm999_vm4, %v1705_v47, %v1601_v62  ;;  %791 = vrot.lane.b32.xlu1 %v4710_v14, %s3670_s24 }
 0x177   : > { %789 = vrot.lane.b32.xlu0 %v4715_v36, %s3670_s24  ;;  %3462 = vmatmul.mubr.msk.f32.gmra.mxu1 %vm1040_vm5, %v4707_v4 }
 0x178   : > { %v1507_v46 = vpop.permute.xlu1 %1506 }
 0x179   : > { %v1413_v26 = vpop.permute.xlu0 %1412  ;;  %v1706_v18 = vsel %vm966_vm3, %v1674_v34, %v1507_v46  ;;  %v372_v46 = vld [vmem:[%s4485_s13 + $0x20] sm:$0xff]  ;;  %v371_v34 = vld [vmem:[%s4485_s13 + $0x18] sm:$0xff] }
 0x17a   : > { %887 = vrot.lane.b32.xlu1 %v4033_v58, %s3671_s29  ;;  %v1675_v7 = vsel %vm933_vm2, %v5824_v31, %v1413_v26 }
 0x17b   : > { %885 = vrot.lane.b32.xlu0 %v4038_v8, %s3671_s29 }
 0x17c   : > { %v1603_v21 = vpop.permute.xlu1 %1602 }
 0x17d   : > { %v4729_v44 = vsel %vm999_vm4, %v1706_v18, %v1603_v21  ;;  %v1509_v33 = vpop.permute.xlu0 %1508 }
 0x17e   : > { %795 = vrot.lane.b32.xlu1 %v4732_v53, %s3670_s24  ;;  %3464 = vmatprep.mubr.msk.f32.mxu1 %vm1040_vm5, %v4729_v44  ;;  %v1707_v41 = vsel %vm966_vm3, %v1675_v7, %v1509_v33  ;;  %v514_v7 = vrot.slane %v371_v34, 1 }
 0x17f   : > { %793 = vrot.lane.b32.xlu0 %v4739_v16, %s3670_s24 }
 0x180   : > { %v1415_v45 = vpop.permute.xlu1 %1414 }
 0x181   : > { %v1605_v19 = vpop.permute.xlu0 %1604  ;;  %v1676_v31 = vsel %vm933_vm2, %v4038_v8, %v1415_v45 }
 0x182   : > { %v4747_v43 = vsel %vm999_vm4, %v1707_v41, %v1605_v19  ;;  %891 = vrot.lane.b32.xlu1 %v4055_v35, %s3671_s29 }
 0x183   : > { %889 = vrot.lane.b32.xlu0 %v4060_v51, %s3671_s29  ;;  %3465 = vmatmul.mubr.msk.f32.gmra.mxu1 %vm1040_vm5, %v4747_v43 }
 0x184   : > { %v1511_v39 = vpop.permute.xlu1 %1510 }
 0x185   : > { %v1417_v59 = vpop.permute.xlu0 %1416  ;;  %v1708_v42 = vsel %vm966_vm3, %v1676_v31, %v1511_v39 }
 0x186   : > { %799 = vrot.lane.b32.xlu1 %v4756_v37, %s3670_s24  ;;  %v1677_v8 = vsel %vm933_vm2, %v4033_v58, %v1417_v59  ;;  %v373_v58 = vld [vmem:[%s4485_s13 + $0x28] sm:$0x3]  ;;  %v640_v59 = vrot.slane %v372_v46, 2 }
 0x187   : > { %797 = vrot.lane.b32.xlu0 %v4763_v60, %s3670_s24  ;;  %v642_v31 = vrot.slane %v373_v58, 2 }
 0x188   : > { %v1607_v15 = vpop.permute.xlu1 %1606 }
 0x189   : > { %v4772_v9 = vsel %vm999_vm4, %v1708_v42, %v1607_v15  ;;  %v1513_v57 = vpop.permute.xlu0 %1512 }
 0x18a   : > { %895 = vrot.lane.b32.xlu1 %v5836_v54, %s3671_s29  ;;  %3467 = vmatprep.mubr.msk.f32.mxu1 %vm1040_vm5, %v4772_v9  ;;  %v1709_v20 = vsel %vm966_vm3, %v1677_v8, %v1513_v57  ;;  %v639_v8 = vrot.slane %v371_v34, 2 }
 0x18b   : > { %893 = vrot.lane.b32.xlu0 %v4071_v50, %s3671_s29 }
 0x18c   : > { %v1419_v55 = vpop.permute.xlu1 %1418 }
 0x18d   : > { %v1609_v32 = vpop.permute.xlu0 %1608  ;;  %v1678_v18 = vsel %vm933_vm2, %v4060_v51, %v1419_v55  ;;  %v3616_v51 = vld [vmem:[%s3723_s22] sm:$0xff] }
 0x18e   : > { %v4784_v47 = vsel %vm999_vm4, %v1709_v20, %v1609_v32  ;;  %803 = vrot.lane.b32.xlu1 %v4500_v6, %s3670_s24  ;;  %v515_v6 = vrot.slane %v372_v46, 1  ;;  %v934_v19 = vsel %vm933_vm2, %v3616_v51, %v4145_v2  ;;  %v643_v32 = vsel %vm553_vm1, %v640_v59, %v642_v31  ;;  %v3618_v51 = vld [vmem:[%s3723_s22 + $0x18] sm:$0xff] }
 0x18f   : > { %801 = vrot.lane.b32.xlu0 %v4497_v24, %s3670_s24  ;;  %3468 = vmatmul.mubr.msk.f32.gmra.mxu1 %vm1040_vm5, %v4784_v47  ;;  %v517_v24 = vrot.slane %v373_v58, 1  ;;  %v967_v42 = vsel %vm966_vm3, %v934_v19, %v4278_v30  ;;  %v3617_v30 = vld [vmem:[%s3723_s22 + $0x8] sm:$0xff] }
 0x190   : > { %v1515_v62 = vpop.permute.xlu1 %1514  ;;  %v516_v57 = vsel %vm428_vm0, %v514_v7, %v515_v6 }
 0x191   : > { %v1421_v26 = vpop.permute.xlu0 %1420  ;;  %v1710_v21 = vsel %vm966_vm3, %v1678_v18, %v1515_v62  ;;  %v518_v39 = vsel %vm428_vm0, %v515_v6, %v517_v24 }
 0x192   : > { %899 = vrot.lane.b32.xlu1 %v4542_v23, %s3671_s29 }
 0x193   : > { %897 = vrot.lane.b32.xlu0 %v4520_v12, %s3671_s29 }
 0x194   : > { %v1611_v33 = vpop.permute.xlu1 %1610 }
 0x195   : > { %v4803_v45 = vsel %vm999_vm4, %v1710_v21, %v1611_v33  ;;  %v1517_v41 = vpop.permute.xlu0 %1516 }
 0x196   : > { %2490 = vrot.lane.b32.xlu1 %v4552_v48, %s3669_s23  ;;  %3470 = vmatprep.mubr.msk.f32.mxu1 %vm1040_vm5, %v4803_v45  ;;  %v1679_v48 = vsel %vm933_vm2, %v4055_v35, %v1421_v26  ;;  %v935_v35 = vsel %vm933_vm2, %v3617_v30, %v4153_v13  ;;  %v641_v26 = vsel %vm553_vm1, %v639_v8, %v640_v59  ;;  %v3163_v13 = vld [vmem:[%s5702_s2 + $0x20] sm:$0xff]  ;;  %v5841_v30 = vld [vmem:[#allocation52_spill] sm:$0xff] }
 0x197   : > { %2488 = vrot.lane.b32.xlu0 %v4539_v5, %s3669_s23  ;;  %v1711_v2 = vsel %vm966_vm3, %v1679_v48, %v1517_v41  ;;  %v968_v62 = vsel %vm966_vm3, %v935_v35, %v4276_v40 }
 0x198   : > { %v838_v15 = vpop.permute.xlu1 %837 }
 0x199   : > { %v1613_v55 = vpop.permute.xlu0 %1612  ;;  %v1000_v20 = vsel %vm999_vm4, %v967_v42, %v838_v15 }
 0x19a   : > { %v4823_v5 = vsel %vm999_vm4, %v1711_v2, %v1613_v55  ;;  %2496 = vrot.lane.b32.xlu1 %v518_v39, %s3670_s24  ;;  %3376 = vmatprep.mubr.msk.f32.mxu0 %vm1040_vm5, %v1000_v20  ;;  %v5839_v2 = vld [vmem:[#allocation54_spill] sm:$0xff]  ;;  %v5840_v20 = vld [vmem:[#allocation5_spill] sm:$0xff] }
 0x19b   : > { %2494 = vrot.lane.b32.xlu0 %v516_v57, %s3670_s24  ;;  %3471 = vmatmul.mubr.msk.f32.gmra.mxu1 %vm1040_vm5, %v4823_v5 }
 0x19c   : > { %v840_v58 = vpop.permute.xlu1 %839 }
 0x19d   : > { %v1001_v18 = vsel %vm999_vm4, %v968_v62, %v840_v58  ;;  %v1423_v6 = vpop.permute.xlu0 %1422  ;;  %v3621_v62 = vld [vmem:[%s3723_s22 + $0x48] sm:$0xff] }
 0x19e   : > { %2502 = vrot.lane.b32.xlu1 %v643_v32, %s3671_s29  ;;  %3377 = vmatmul.mubr.msk.f32.vlgmr.msra.gmra.mxu0 %vm1040_vm5, %v1001_v18  ;;  %v1680_v21 = vsel %vm933_vm2, %v4071_v50, %v1423_v6  ;;  %v936_v50 = vsel %vm933_vm2, %v3618_v51, %v4142_v61  ;;  %v3619_v61 = vld [vmem:[%s3723_s22 + $0x30] sm:$0xff]  ;;  %v5842_v58 = vld [vmem:[#allocation27_spill] sm:$0xff]  ;;  %v5843_v18 = vld [vmem:[#allocation9_spill] sm:$0xff] }
 0x19f   : > { %2500 = vrot.lane.b32.xlu0 %v641_v26, %s3671_s29  ;;  %3477 = vmatpush3.msra.mxu0 %v3164_v38  ;;  %v969_v19 = vsel %vm966_vm3, %v936_v50, %v4287_v11  ;;  %v938_v11 = vsel %vm933_vm2, %v3619_v61, %v4162_v0  ;;  %v940_v26 = vsel %vm933_vm2, %v3621_v62, %v5842_v58  ;;  %v3622_v6 = vld [vmem:[%s3723_s22 + $0x38] sm:$0xff] }
 0x1a0   : > { %v1519_v24 = vpop.permute.xlu1 %1518  ;;  %3478 = vmatprep.subr.mxu0 %v3163_v13  ;;  %v971_v55 = vsel %vm966_vm3, %v938_v11, %v5839_v2 }
 0x1a1   : > { %v1425_v40 = vpop.permute.xlu0 %1424  ;;  %3479 = vmatpush3.msra.mxu0 %v3163_v13  ;;  %v1712_v33 = vsel %vm966_vm3, %v1680_v21, %v1519_v24  ;;  %v5844_v13 = vld [vmem:[#allocation25_spill] sm:$0xff] }
 0x1a2   : > { %2232 = vrot.lane.b32.xlu1 %v4542_v23, %s3669_s23  ;;  %v1681_v59 = vsel %vm933_vm2, %v5836_v54, %v1425_v40  ;;  %v3620_v54 = vld [vmem:[%s3723_s22 + $0x20] sm:$0xff]  ;;  %v939_v24 = vsel %vm933_vm2, %v3622_v6, %v5844_v13  ;;  %v5845_v40 = vld [vmem:[#allocation56_spill] sm:$0xff]  ;;  %v3625_v13 = vld [vmem:[%s3723_s22 + $0x78] sm:$0xff] }
 0x1a3   : > { %2230 = vrot.lane.b32.xlu0 %v4520_v12, %s3669_s23  ;;  %v973_v21 = vsel %vm966_vm3, %v940_v26, %v5845_v40  ;;  %v5854_v40 = vld [vmem:[#allocation6_spill] sm:$0xff] }
 0x1a4   : > { %v1615_v7 = vpop.permute.xlu1 %1614 }
 0x1a5   : > { %v4852_v41 = vsel %vm999_vm4, %v1712_v33, %v1615_v7  ;;  %v1521_v38 = vpop.permute.xlu0 %1520  ;;  %v5846_v33 = vld [vmem:[#allocation2_spill] sm:$0xff] }
 0x1a6   : > { %3473 = vmatprep.mubr.msk.f32.mxu1 %vm1040_vm5, %v4852_v41  ;;  %2238 = vrot.lane.b32.xlu1 %v372_v46, %s3670_s24  ;;  %v1713_v42 = vsel %vm966_vm3, %v1681_v59, %v1521_v38  ;;  %v5847_v38 = vld [vmem:[#allocation53_spill] sm:$0xff]  ;;  %v4920_v59 = vld [vmem:[%s5703_s3] ss:$0 sm:$0xff] }
 0x1a7   : > { %2236 = vrot.lane.b32.xlu0 %v371_v34, %s3670_s24  ;;  %v5838_v34 = vld [vmem:[#allocation24_spill] sm:$0xff]  ;;  %v972_v51 = vsel %vm966_vm3, %v939_v24, %v5847_v38  ;;  %v5853_v24 = vld [vmem:[#allocation31_spill] sm:$0xff] }
 0x1a8   : > { %v842_v31 = vpop.permute.xlu1 %841  ;;  %v937_v8 = vsel %vm933_vm2, %v3620_v54, %v5838_v34  ;;  %v5849_v54 = vld [vmem:[#allocation8_spill] sm:$0xff] }
 0x1a9   : > { %v4867_v48 = vsel %vm999_vm4, %v969_v19, %v842_v31  ;;  %v1617_v46 = vpop.permute.xlu0 %1616  ;;  %v970_v0 = vsel %vm966_vm3, %v937_v8, %v5841_v30  ;;  %v3624_v34 = vld [vmem:[%s3723_s22 + $0x50] sm:$0xff]  ;;  %v5850_v8 = vld [vmem:[#allocation26_spill] sm:$0xff] }
 0x1aa   : > { %v4870_v15 = vsel %vm999_vm4, %v1713_v42, %v1617_v46  ;;  %3379 = vmatprep.mubr.msk.f32.mxu0 %vm1040_vm5, %v4867_v48  ;;  %2244 = vrot.lane.b32.xlu1 %v518_v39, %s3671_s29  ;;  %v3623_v42 = vld [vmem:[%s3723_s22 + $0x60] sm:$0xff]  ;;  %v5848_v46 = vld [vmem:[#allocation29_spill] sm:$0xff]  ;;  %v941_v2 = vsel %vm933_vm2, %v3624_v34, %v5850_v8  ;;  %v5856_v38 = vld [vmem:[#allocation60_spill] sm:$0xff] }
 0x1ab   : > { %3474 = vmatmul.mubr.msk.f32.gmra.mxu1 %vm1040_vm5, %v4870_v15  ;;  %2242 = vrot.lane.b32.xlu0 %v516_v57, %s3671_s29  ;;  %v942_v61 = vsel %vm933_vm2, %v3623_v42, %v5848_v46  ;;  %v5858_v46 = vld [vmem:[#allocation57_spill] sm:$0xff]  ;;  %v3627_v8 = vld [vmem:[%s3723_s22 + $0x90] sm:$0xff] }
 0x1ac   : > { %3532 = vmatprep.mubr.msk.f32.mxu1 %vm1040_vm5, %v5840_v20  ;;  %v846_v39 = vpop.permute.xlu1 %845 }
 0x1ad   : > { %v4891_v35 = vsel %vm999_vm4, %v971_v55, %v846_v39  ;;  %v844_v32 = vpop.permute.xlu0 %843  ;;  %v5851_v55 = vld [vmem:[#allocation58_spill] sm:$0xff] }
 0x1ae   : > { %v4894_v57 = vsel %vm999_vm4, %v970_v0, %v844_v32  ;;  %v975_v20 = vsel %vm966_vm3, %v942_v61, %v5851_v55  ;;  %v5852_v0 = vld [vmem:[#allocation55_spill] sm:$0xff] }
 0x1af   : > { %3380 = vmatmul.mubr.msk.f32.gmra.mxu0 %vm1040_vm5, %v4894_v57  ;;  %3533 = vmatmul.mubr.msk.f32.vlgmr.msra.gmra.mxu1 %vm1040_vm5, %v5843_v18  ;;  %v974_v32 = vsel %vm966_vm3, %v941_v2, %v5852_v0  ;;  %v5859_v2 = vld [vmem:[#allocation33_spill] sm:$0xff] }
 0x1b0   : > { %3382 = vmatprep.mubr.msk.f32.mxu0 %vm1040_vm5, %v4891_v35  ;;  %3535 = vmatprep.mubr.msk.f32.mxu1 %vm1040_vm5, %v5846_v33  ;;  %v850_v7 = vpop.permute.xlu1 %849  ;;  %v5855_v33 = vld [vmem:[#allocation28_spill] sm:$0xff]  ;;  %v946_v55 = vsel %vm933_vm2, %v3627_v8, %v5859_v2 }
 0x1b1   : > { %v4915_v50 = vsel %vm999_vm4, %v973_v21, %v850_v7  ;;  %v848_v19 = vpop.permute.xlu0 %847  ;;  %v3626_v21 = vld [vmem:[%s3723_s22 + $0x68] sm:$0xff] }
 0x1b2   : > { %v4923_v31 = vsel %vm999_vm4, %v972_v51, %v848_v19  ;;  %v943_v7 = vsel %vm933_vm2, %v3626_v21, %v5855_v33  ;;  %v5857_v19 = vld [vmem:[#allocation15_spill] sm:$0xff] }
 0x1b3   : > { %3383 = vmatmul.mubr.msk.f32.gmra.mxu0 %vm1040_vm5, %v4923_v31  ;;  %v3430_v11 = vpop.f32.mrf.mxu1  ;;  %3536 = vmatmul.mubr.msk.f32.gmra.mxu1 %vm1040_vm5, %v5849_v54  ;;  %v976_v61 = vsel %vm966_vm3, %v943_v7, %v5858_v46  ;;  %v3629_v7 = vld [vmem:[%s3723_s22 + $0x98] sm:$0xff]  ;;  %v5866_v46 = vld [vmem:[#allocation4_spill] sm:$0xff] }
 0x1b4   : > { %v1917_v39 = vadd.f32 %v3430_v11, %v4920_v59  ;;  %3385 = vmatprep.mubr.msk.f32.mxu0 %vm1040_vm5, %v4915_v50  ;;  %3538 = vmatprep.mubr.msk.f32.mxu1 %vm1040_vm5, %v4430_v1  ;;  %v854_v30 = vpop.permute.xlu1 %853  ;;  %v944_v1 = vsel %vm933_vm2, %v3625_v13, %v5853_v24  ;;  %v5864_v13 = vld [vmem:[#allocation59_spill] sm:$0xff] }
 0x1b5   : > { %v4945_v62 = vsel %vm999_vm4, %v975_v20, %v854_v30  ;;  %v852_v58 = vpop.permute.xlu0 %851  ;;  %v1911_v26 = vpop.f32.mrf.mxu1  ;;  %v977_v51 = vsel %vm966_vm3, %v944_v1, %v5856_v38  ;;  %v5860_v20 = vld [vmem:[#allocation3_spill] sm:$0xff]  ;;  %v5861_v30 = vld [vmem:[#allocation30_spill] sm:$0xff]  ;;  %v5865_v38 = vld [vmem:[#allocation32_spill] sm:$0xff] }
 0x1b6   : > { %v4948_v18 = vsel %vm999_vm4, %v974_v32, %v852_v58  ;;  %v1912_v6 = vadd.f32 %v4920_v59, %v1911_v26  ;;  %2104 = vrot.lane.b32.xlu1 %v1917_v39, %s3669_s23  ;;  %v3628_v39 = vld [vmem:[%s3723_s22 + $0x80] sm:$0xff]  ;;  %v5862_v32 = vld [vmem:[#allocation61_spill] sm:$0xff]  ;;  %v5863_v26 = vld [vmem:[#allocation7_spill] sm:$0xff] }
 0x1b7   : > { %3386 = vmatmul.mubr.msk.f32.gmra.mxu0 %vm1040_vm5, %v4948_v18  ;;  %3539 = vmatmul.mubr.msk.f32.gmra.mxu1 %vm1040_vm5, %v5854_v40  ;;  %v945_v0 = vsel %vm933_vm2, %v3628_v39, %v5861_v30  ;;  %v979_v58 = vsel %vm966_vm3, %v946_v55, %v5862_v32  ;;  %v3630_v55 = vld [vmem:[%s3723_s22 + $0xb0] sm:$0xff]  ;;  %v5868_v30 = vld [vmem:[#allocation35_spill] sm:$0xff] }
 0x1b8   : > { %3388 = vmatprep.mubr.msk.f32.mxu0 %vm1040_vm5, %v4945_v62  ;;  %3541 = vmatprep.mubr.msk.f32.mxu1 %vm1040_vm5, %v5857_v19  ;;  %v858_v42 = vpop.permute.xlu1 %857  ;;  %v978_v24 = vsel %vm966_vm3, %v945_v0, %v5864_v13 }
 0x1b9   : > { %2102 = vrot.lane.b32.xlu0 %v1912_v6, %s3669_s23  ;;  %v4972_v11 = vsel %vm999_vm4, %v977_v51, %v858_v42  ;;  %v856_v54 = vpop.permute.xlu0 %855  ;;  %v947_v51 = vsel %vm933_vm2, %v3629_v7, %v5865_v38  ;;  %v5870_v7 = vld [vmem:[#allocation36_spill] sm:$0xff] }
 0x1ba   : > { %v4975_v34 = vsel %vm999_vm4, %v976_v61, %v856_v54  ;;  %v980_v61 = vsel %vm966_vm3, %v947_v51, %v5866_v46 }
 0x1bb   : > { %3389 = vmatmul.mubr.msk.f32.gmra.mxu0 %vm1040_vm5, %v4975_v34  ;;  %3542 = vmatmul.mubr.msk.f32.gmra.mxu1 %vm1040_vm5, %v5860_v20  ;;  %v5867_v20 = vld [vmem:[#allocation34_spill] sm:$0xff] }
 0x1bc   : > { %3391 = vmatprep.mubr.msk.f32.mxu0 %vm1040_vm5, %v4972_v11  ;;  %3544 = vmatprep.mubr.msk.f32.mxu1 %vm1040_vm5, %v5863_v26  ;;  %v862_v6 = vpop.permute.xlu1 %861  ;;  %v949_v39 = vsel %vm933_vm2, %v3630_v55, %v5867_v20  ;;  %v5869_v26 = vld [vmem:[#allocation10_spill] sm:$0xff] }
 0x1bd   : > { %v4996_v1 = vsel %vm999_vm4, %v979_v58, %v862_v6  ;;  %v860_v40 = vpop.permute.xlu0 %859 }
 0x1be   : > { %v4999_v21 = vsel %vm999_vm4, %v978_v24, %v860_v40 }
 0x1bf   : > { %3392 = vmatmul.mubr.msk.f32.gmra.mxu0 %vm1040_vm5, %v4999_v21  ;;  %v3433_v33 = vpop.f32.mrf.mxu1  ;;  %3545 = vmatmul.mubr.msk.f32.gmra.mxu1 %vm1040_vm5, %v4531_v29 }
 0x1c0   : > { %v1927_v19 = vadd.f32 %v3433_v33, %v4920_v59  ;;  %3394 = vmatprep.mubr.msk.f32.mxu0 %vm1040_vm5, %v4996_v1  ;;  %3547 = vmatprep.mubr.msk.f32.mxu1 %vm1040_vm5, %v4555_v27  ;;  %v772_v42 = vpop.permute.xlu1 %771  ;;  %v3631_v27 = vld [vmem:[%s3723_s22 + $0xa8] sm:$0xff] }
 0x1c1   : > { %v864_v54 = vpop.permute.xlu0 %863  ;;  %v1921_v8 = vpop.f32.mrf.mxu1  ;;  %v948_v0 = vsel %vm933_vm2, %v3631_v27, %v5868_v30  ;;  %v982_v32 = vsel %vm966_vm3, %v949_v39, %v772_v42  ;;  %v3632_v33 = vld [vmem:[%s3723_s22 + $0xc8] sm:$0xff]  ;;  %v5871_v42 = vld [vmem:[#allocation37_spill] sm:$0xff]  ;;  %v3634_v27 = vld [vmem:[%s3723_s22 + $0xe0] sm:$0xff] }
 0x1c2   : > { %v5016_v29 = vsel %vm999_vm4, %v980_v61, %v864_v54  ;;  %v1922_v2 = vadd.f32 %v4920_v59, %v1921_v8  ;;  %2108 = vrot.lane.b32.xlu1 %v1927_v19, %s3669_s23  ;;  %v981_v6 = vsel %vm966_vm3, %v948_v0, %v5869_v26  ;;  %v951_v38 = vsel %vm933_vm2, %v3632_v33, %v5870_v7  ;;  %v3633_v19 = vld [vmem:[%s3723_s22 + $0xc0] sm:$0xff] }
 0x1c3   : > { %3395 = vmatmul.mubr.msk.f32.gmra.mxu0 %vm1040_vm5, %v5016_v29  ;;  %3548 = vmatmul.mubr.msk.f32.gmra.mxu1 %vm1040_vm5, %v4567_v63  ;;  %v5872_v30 = vld [vmem:[#allocation38_spill] sm:$0xff] }
 0x1c4   : > { %3550 = vmatprep.mubr.msk.f32.mxu1 %vm1040_vm5, %v4583_v22  ;;  %2106 = vrot.lane.b32.xlu0 %v1922_v2, %s3669_s23  ;;  %v868_v58 = vpop.permute.xlu1 %867  ;;  %v953_v0 = vsel %vm933_vm2, %v3634_v27, %v5872_v30 }
 0x1c5   : > { %v5037_v13 = vsel %vm999_vm4, %v982_v32, %v868_v58  ;;  %v866_v63 = vpop.permute.xlu0 %865  ;;  %v3635_v32 = vld [vmem:[%s3723_s22 + $0xd8] sm:$0xff]  ;;  %v5873_v58 = vld [vmem:[#allocation39_spill] sm:$0xff] }
 0x1c6   : > { %v5040_v24 = vsel %vm999_vm4, %v981_v6, %v866_v63 }
 0x1c7   : > { %3397 = vmatprep.mubr.msk.f32.mxu0 %vm1040_vm5, %v5040_v24  ;;  %3551 = vmatmul.mubr.msk.f32.gmra.mxu1 %vm1040_vm5, %v4595_v3  ;;  %v950_v3 = vsel %vm933_vm2, %v3633_v19, %v5871_v42  ;;  %v3636_v19 = vld [vmem:[%s3723_s22 + $0xf8] sm:$0xff]  ;;  %v5874_v42 = vld [vmem:[#allocation40_spill] sm:$0xff] }
 0x1c8   : > { %3398 = vmatmul.mubr.msk.f32.gmra.mxu0 %vm1040_vm5, %v5037_v13  ;;  %3553 = vmatprep.mubr.msk.f32.mxu1 %vm1040_vm5, %v4611_v17  ;;  %v776_v22 = vpop.permute.xlu1 %775 }
 0x1c9   : > { %v774_v40 = vpop.permute.xlu0 %773  ;;  %v984_v46 = vsel %vm966_vm3, %v951_v38, %v776_v22 }
 0x1ca   : > { %v983_v54 = vsel %vm966_vm3, %v950_v3, %v774_v40  ;;  %v955_v3 = vsel %vm933_vm2, %v3636_v19, %v5874_v42  ;;  %v5879_v19 = vld [vmem:[#allocation45_spill] sm:$0xff] }
 0x1cb   : > { %v3436_v51 = vpop.f32.mrf.mxu1  ;;  %3554 = vmatmul.mubr.msk.f32.gmra.mxu1 %vm1040_vm5, %v4623_v10 }
 0x1cc   : > { %v1937_v61 = vadd.f32 %v3436_v51, %v4920_v59  ;;  %3556 = vmatprep.mubr.msk.f32.mxu1 %vm1040_vm5, %v4639_v25  ;;  %v872_v17 = vpop.permute.xlu1 %871 }
 0x1cd   : > { %v5064_v8 = vsel %vm999_vm4, %v984_v46, %v872_v17  ;;  %v870_v10 = vpop.permute.xlu0 %869  ;;  %v1931_v2 = vpop.f32.mrf.mxu1  ;;  %v5875_v46 = vld [vmem:[#allocation41_spill] sm:$0xff] }
 0x1ce   : > { %v5067_v55 = vsel %vm999_vm4, %v983_v54, %v870_v10  ;;  %v1932_v20 = vadd.f32 %v4920_v59, %v1931_v2  ;;  %2112 = vrot.lane.b32.xlu1 %v1937_v61, %s3669_s23 }
 0x1cf   : > { %3400 = vmatprep.mubr.msk.f32.mxu0 %vm1040_vm5, %v5067_v55  ;;  %3557 = vmatmul.mubr.msk.f32.gmra.mxu1 %vm1040_vm5, %v4651_v56  ;;  %v952_v56 = vsel %vm933_vm2, %v3635_v32, %v5873_v58  ;;  %v5877_v32 = vld [vmem:[#allocation43_spill] sm:$0xff] }
 0x1d0   : > { %3401 = vmatmul.mubr.msk.f32.gmra.mxu0 %vm1040_vm5, %v5064_v8  ;;  %3559 = vmatprep.mubr.msk.f32.mxu1 %vm1040_vm5, %v4667_v52  ;;  %v780_v25 = vpop.permute.xlu1 %779 }
 0x1d1   : > { %2110 = vrot.lane.b32.xlu0 %v1932_v20, %s3669_s23  ;;  %v778_v39 = vpop.permute.xlu0 %777  ;;  %v986_v26 = vsel %vm966_vm3, %v953_v0, %v780_v25  ;;  %v3638_v25 = vld [vmem:[%s3723_s22 + $0x110] sm:$0xff]  ;;  %v3639_v0 = vld [vmem:[%s3723_s22 + $0x108] sm:$0xff] }
 0x1d2   : > { %v985_v6 = vsel %vm966_vm3, %v952_v56, %v778_v39  ;;  %v5876_v39 = vld [vmem:[#allocation42_spill] sm:$0xff] }
 0x1d3   : > { %3560 = vmatmul.mubr.msk.f32.gmra.mxu1 %vm1040_vm5, %v4679_v49  ;;  %v957_v27 = vsel %vm933_vm2, %v3638_v25, %v5876_v39  ;;  %v5880_v39 = vld [vmem:[#allocation46_spill] sm:$0xff] }
 0x1d4   : > { %3562 = vmatprep.mubr.msk.f32.mxu1 %vm1040_vm5, %v4695_v28  ;;  %v876_v52 = vpop.permute.xlu1 %875 }
 0x1d5   : > { %v5093_v63 = vsel %vm999_vm4, %v986_v26, %v876_v52  ;;  %v874_v22 = vpop.permute.xlu0 %873 }
 0x1d6   : > { %v5096_v49 = vsel %vm999_vm4, %v985_v6, %v874_v22 }
 0x1d7   : > { %3403 = vmatprep.mubr.msk.f32.mxu0 %vm1040_vm5, %v5096_v49  ;;  %v3439_v40 = vpop.f32.mrf.mxu1  ;;  %3563 = vmatmul.mubr.msk.f32.gmra.mxu1 %vm1040_vm5, %v4707_v4  ;;  %v3637_v4 = vld [vmem:[%s3723_s22 + $0xf0] sm:$0xff] }
 0x1d8   : > { %v1947_v28 = vadd.f32 %v3439_v40, %v4920_v59  ;;  %3404 = vmatmul.mubr.msk.f32.gmra.mxu0 %vm1040_vm5, %v5093_v63  ;;  %3565 = vmatprep.mubr.msk.f32.mxu1 %vm1040_vm5, %v4729_v44  ;;  %v784_v33 = vpop.permute.xlu1 %783  ;;  %v954_v61 = vsel %vm933_vm2, %v3637_v4, %v5875_v46 }
 0x1d9   : > { %v782_v7 = vpop.permute.xlu0 %781  ;;  %v1941_v38 = vpop.f32.mrf.mxu1  ;;  %v988_v44 = vsel %vm966_vm3, %v955_v3, %v784_v33  ;;  %v3640_v33 = vld [vmem:[%s3723_s22 + $0x128] sm:$0xff] }
 0x1da   : > { %v1942_v51 = vadd.f32 %v4920_v59, %v1941_v38  ;;  %2116 = vrot.lane.b32.xlu1 %v1947_v28, %s3669_s23  ;;  %v987_v54 = vsel %vm966_vm3, %v954_v61, %v782_v7  ;;  %v5878_v7 = vld [vmem:[#allocation44_spill] sm:$0xff] }
 0x1db   : > { %3566 = vmatmul.mubr.msk.f32.gmra.mxu1 %vm1040_vm5, %v4747_v43  ;;  %v959_v38 = vsel %vm933_vm2, %v3640_v33, %v5878_v7 }
 0x1dc   : > { %3568 = vmatprep.mubr.msk.f32.mxu1 %vm1040_vm5, %v4772_v9  ;;  %2114 = vrot.lane.b32.xlu0 %v1942_v51, %s3669_s23  ;;  %v880_v17 = vpop.permute.xlu1 %879  ;;  %v3641_v51 = vld [vmem:[%s3723_s22 + $0x120] sm:$0xff]  ;;  %s3235_s22 = sshll.u32 %s5891_s15, 9 }
 0x1dd   : > { %v5123_v10 = vsel %vm999_vm4, %v988_v44, %v880_v17  ;;  %v878_v43 = vpop.permute.xlu0 %877  ;;  %v958_v42 = vsel %vm933_vm2, %v3641_v51, %v5879_v19  ;;  %s5359_s30 = scalar_lea.vmem %s5704_s4, %s3235_s22 }
 0x1de   : > { %v5126_v2 = vsel %vm999_vm4, %v987_v54, %v878_v43 }
 0x1df   : > { %3406 = vmatprep.mubr.msk.f32.mxu0 %vm1040_vm5, %v5126_v2  ;;  %3569 = vmatmul.mubr.msk.f32.gmra.mxu1 %vm1040_vm5, %v4784_v47  ;;  %v956_v47 = vsel %vm933_vm2, %v3639_v0, %v5877_v32 }
 0x1e0   : > { %3407 = vmatmul.mubr.msk.f32.gmra.mxu0 %vm1040_vm5, %v5123_v10  ;;  %3571 = vmatprep.mubr.msk.f32.mxu1 %vm1040_vm5, %v4803_v45  ;;  %v788_v9 = vpop.permute.xlu1 %787 }
 0x1e1   : > { %v786_v20 = vpop.permute.xlu0 %785  ;;  %v990_v58 = vsel %vm966_vm3, %v957_v27, %v788_v9  ;;  %v961_v27 = vsel %vm933_vm2, %v4710_v14, %v5880_v39 }
 0x1e2   : > { %v989_v26 = vsel %vm966_vm3, %v956_v47, %v786_v20 }
 0x1e3   : > { %v3442_v30 = vpop.f32.mrf.mxu1  ;;  %3572 = vmatmul.mubr.msk.f32.gmra.mxu1 %vm1040_vm5, %v4823_v5 }
 0x1e4   : > { %v1957_v56 = vadd.f32 %v3442_v30, %v4920_v59  ;;  %3574 = vmatprep.mubr.msk.f32.mxu1 %vm1040_vm5, %v4852_v41  ;;  %v884_v45 = vpop.permute.xlu1 %883  ;;  %v5881_v30 = vld [vmem:[#allocation47_spill] sm:$0xff] }
 0x1e5   : > { %v5150_v52 = vsel %vm999_vm4, %v990_v58, %v884_v45  ;;  %v882_v5 = vpop.permute.xlu0 %881  ;;  %v1951_v6 = vpop.f32.mrf.mxu1  ;;  %v960_v0 = vsel %vm933_vm2, %v4715_v36, %v5881_v30 }
 0x1e6   : > { %v5153_v22 = vsel %vm999_vm4, %v989_v26, %v882_v5  ;;  %v1952_v40 = vadd.f32 %v4920_v59, %v1951_v6  ;;  %2120 = vrot.lane.b32.xlu1 %v1957_v56, %s3669_s23  ;;  %v5882_v5 = vld [vmem:[#allocation48_spill] sm:$0xff] }
 0x1e7   : > { %3409 = vmatprep.mubr.msk.f32.mxu0 %vm1040_vm5, %v5153_v22  ;;  %3575 = vmatmul.mubr.msk.f32.gmra.mxu1 %vm1040_vm5, %v4870_v15  ;;  %v963_v6 = vsel %vm933_vm2, %v4732_v53, %v5882_v5 }
 0x1e8   : > { %3410 = vmatmul.mubr.msk.f32.gmra.mxu0 %vm1040_vm5, %v5150_v52  ;;  %2118 = vrot.lane.b32.xlu0 %v1952_v40, %s3669_s23  ;;  %v792_v41 = vpop.permute.xlu1 %791 }
 0x1e9   : > { %v790_v28 = vpop.permute.xlu0 %789  ;;  %v992_v3 = vsel %vm966_vm3, %v959_v38, %v792_v41  ;;  %v5883_v41 = vld [vmem:[#allocation49_spill] sm:$0xff] }
 0x1ea   : > { %v991_v15 = vsel %vm966_vm3, %v958_v42, %v790_v28  ;;  %v962_v28 = vsel %vm933_vm2, %v4739_v16, %v5883_v41 }
 0x1ec   : > { %v888_v4 = vpop.permute.xlu1 %887 }
 0x1ed   : > { %v5173_v46 = vsel %vm999_vm4, %v992_v3, %v888_v4  ;;  %v886_v61 = vpop.permute.xlu0 %885 }
 0x1ee   : > { %v5176_v44 = vsel %vm999_vm4, %v991_v15, %v886_v61  ;;  %v5884_v61 = vld [vmem:[#allocation50_spill] sm:$0xff] }
 0x1ef   : > { %3412 = vmatprep.mubr.msk.f32.mxu0 %vm1040_vm5, %v5176_v44  ;;  %v3445_v17 = vpop.f32.mrf.mxu1 }
 0x1f0   : > { %v1967_v54 = vadd.f32 %v3445_v17, %v4920_v59  ;;  %3413 = vmatmul.mubr.msk.f32.gmra.mxu0 %vm1040_vm5, %v5173_v46  ;;  %v796_v43 = vpop.permute.xlu1 %795  ;;  %v965_v17 = vsel %vm933_vm2, %v4756_v37, %v5884_v61 }
 0x1f1   : > { %v794_v9 = vpop.permute.xlu0 %793  ;;  %v1961_v20 = vpop.f32.mrf.mxu1  ;;  %v994_v32 = vsel %vm966_vm3, %v961_v27, %v796_v43 }
 0x1f2   : > { %v1962_v25 = vadd.f32 %v4920_v59, %v1961_v20  ;;  %2124 = vrot.lane.b32.xlu1 %v1967_v54, %s3669_s23  ;;  %v993_v58 = vsel %vm966_vm3, %v960_v0, %v794_v9  ;;  %v5885_v54 = vld [vmem:[#allocation51_spill] sm:$0xff] }
 0x1f3   : > { %v964_v43 = vsel %vm933_vm2, %v4763_v60, %v5885_v54 }
 0x1f4   : > { %2122 = vrot.lane.b32.xlu0 %v1962_v25, %s3669_s23  ;;  %v892_v47 = vpop.permute.xlu1 %891 }
 0x1f5   : > { %v5195_v56 = vsel %vm999_vm4, %v994_v32, %v892_v47  ;;  %v890_v45 = vpop.permute.xlu0 %889 }
 0x1f6   : > { %v5198_v26 = vsel %vm999_vm4, %v993_v58, %v890_v45 }
 0x1f7   : > { %3415 = vmatprep.mubr.msk.f32.mxu0 %vm1040_vm5, %v5198_v26 }
 0x1f8   : > { %3416 = vmatmul.mubr.msk.f32.gmra.mxu0 %vm1040_vm5, %v5195_v56  ;;  %v800_v14 = vpop.permute.xlu1 %799 }
 0x1f9   : > { %v798_v36 = vpop.permute.xlu0 %797  ;;  %v996_v33 = vsel %vm966_vm3, %v963_v6, %v800_v14 }
 0x1fa   : > { %v995_v51 = vsel %vm966_vm3, %v962_v28, %v798_v36 }
 0x1fb   : > { %v3448_v40 = vpop.f32.mrf.mxu1 }
 0x1fc   : > { %v1977_v7 = vadd.f32 %v3448_v40, %v4920_v59  ;;  %v896_v38 = vpop.permute.xlu1 %895 }
 0x1fd   : > { %v5214_v19 = vsel %vm999_vm4, %v996_v33, %v896_v38  ;;  %v894_v42 = vpop.permute.xlu0 %893  ;;  %v1971_v3 = vpop.f32.mrf.mxu1 }
 0x1fe   : > { %v5217_v4 = vsel %vm999_vm4, %v995_v51, %v894_v42  ;;  %v1972_v53 = vadd.f32 %v4920_v59, %v1971_v3  ;;  %2128 = vrot.lane.b32.xlu1 %v1977_v7, %s3669_s23 }
 0x1ff   : > { %3418 = vmatprep.mubr.msk.f32.mxu0 %vm1040_vm5, %v5217_v4 }
 0x200   : > { %3419 = vmatmul.mubr.msk.f32.gmra.mxu0 %vm1040_vm5, %v5214_v19  ;;  %2126 = vrot.lane.b32.xlu0 %v1972_v53, %s3669_s23  ;;  %v804_v16 = vpop.permute.xlu1 %803 }
 0x201   : > { %v802_v15 = vpop.permute.xlu0 %801  ;;  %v998_v9 = vsel %vm966_vm3, %v965_v17, %v804_v16 }
 0x202   : > { %v997_v25 = vsel %vm966_vm3, %v964_v43, %v802_v15 }
 0x204   : > { %v900_v20 = vpop.permute.xlu1 %899 }
 0x205   : > { %v5235_v39 = vsel %vm999_vm4, %v998_v9, %v900_v20  ;;  %v898_v27 = vpop.permute.xlu0 %897 }
 0x206   : > { %v5238_v30 = vsel %vm999_vm4, %v997_v25, %v898_v27 }
 0x207   : > { %3421 = vmatprep.mubr.msk.f32.mxu0 %vm1040_vm5, %v5238_v30  ;;  %v3451_v37 = vpop.f32.mrf.mxu1 }
 0x208   : > { %v1987_v0 = vadd.f32 %v3451_v37, %v4920_v59  ;;  %3422 = vmatmul.mubr.msk.f32.gmra.mxu0 %vm1040_vm5, %v5235_v39  ;;  %v2491_v60 = vpop.permute.xlu1 %2490 }
 0x209   : > { %3480 = vmatprep.mubr.msk.f32.mxu0 %vm1040_vm5, %v4867_v48  ;;  %v2489_v32 = vpop.permute.xlu0 %2488  ;;  %v1981_v47 = vpop.f32.mrf.mxu1  ;;  %v2507_v36 = vsel %vm933_vm2, %v4542_v23, %v2491_v60 }
 0x20a   : > { %v1982_v58 = vadd.f32 %v4920_v59, %v1981_v47  ;;  %2132 = vrot.lane.b32.xlu1 %v1987_v0, %s3669_s23  ;;  %v2506_v48 = vsel %vm933_vm2, %v4520_v12, %v2489_v32 }
 0x20c   : > { %3481 = vmatmul.mubr.msk.f32.vlgmr.msra.gmra.mxu0 %vm1040_vm5, %v4894_v57  ;;  %2130 = vrot.lane.b32.xlu0 %v1982_v58, %s3669_s23  ;;  %v2497_v45 = vpop.permute.xlu1 %2496 }
 0x20d   : > { %3483 = vmatprep.mubr.msk.f32.mxu0 %vm1040_vm5, %v4891_v35  ;;  %v2495_v14 = vpop.permute.xlu0 %2494  ;;  %v2509_v5 = vsel %vm966_vm3, %v2507_v36, %v2497_v45 }
 0x20e   : > { %v2508_v57 = vsel %vm966_vm3, %v2506_v48, %v2495_v14 }
 0x210   : > { %3484 = vmatmul.mubr.msk.f32.gmra.mxu0 %vm1040_vm5, %v4923_v31  ;;  %v2503_v6 = vpop.permute.xlu1 %2502 }
 0x211   : > { %v2511_v40 = vsel %vm999_vm4, %v2509_v5, %v2503_v6  ;;  %3486 = vmatprep.mubr.msk.f32.mxu0 %vm1040_vm5, %v4915_v50  ;;  %v2501_v35 = vpop.permute.xlu0 %2500 }
 0x212   : > { %v2510_v41 = vsel %vm999_vm4, %v2508_v57, %v2501_v35 }
 0x213   : > { %v3454_v23 = vpop.f32.mrf.mxu1  ;;  %3577 = vmatprep.mubr.msk.f32.mxu1 %vm1040_vm5, %v2510_v41 }
 0x214   : > { %v1997_v12 = vadd.f32 %v3454_v23, %v4920_v59  ;;  %3487 = vmatmul.mubr.msk.f32.gmra.mxu0 %vm1040_vm5, %v4948_v18  ;;  %3578 = vmatmul.mubr.msk.f32.gmra.mxu1 %vm1040_vm5, %v2511_v40 }
 0x215   : > { %v1991_v31 = vpop.f32.mrf.mxu1  ;;  %3489 = vmatprep.mubr.msk.f32.mxu0 %vm1040_vm5, %v4945_v62 }
 0x216   : > { %v1992_v28 = vadd.f32 %v4920_v59, %v1991_v31  ;;  %2136 = vrot.lane.b32.xlu1 %v1997_v12, %s3669_s23 }
 0x218   : > { %3490 = vmatmul.mubr.msk.f32.gmra.mxu0 %vm1040_vm5, %v4975_v34  ;;  %2134 = vrot.lane.b32.xlu0 %v1992_v28, %s3669_s23 }
 0x219   : > { %3492 = vmatprep.mubr.msk.f32.mxu0 %vm1040_vm5, %v4972_v11 }
 0x21c   : > { %3493 = vmatmul.mubr.msk.f32.gmra.mxu0 %vm1040_vm5, %v4999_v21 }
 0x21d   : > { %3495 = vmatprep.mubr.msk.f32.mxu0 %vm1040_vm5, %v4996_v1 }
 0x21f   : > { %v3457_v50 = vpop.f32.mrf.mxu1 }
 0x220   : > { %v2007_v62 = vadd.f32 %v3457_v50, %v4920_v59  ;;  %3496 = vmatmul.mubr.msk.f32.gmra.mxu0 %vm1040_vm5, %v5016_v29 }
 0x221   : > { %v2001_v18 = vpop.f32.mrf.mxu1  ;;  %3498 = vmatprep.mubr.msk.f32.mxu0 %vm1040_vm5, %v5040_v24 }
 0x222   : > { %v2002_v34 = vadd.f32 %v4920_v59, %v2001_v18  ;;  %2140 = vrot.lane.b32.xlu1 %v2007_v62, %s3669_s23 }
 0x224   : > { %3499 = vmatmul.mubr.msk.f32.gmra.mxu0 %vm1040_vm5, %v5037_v13  ;;  %2138 = vrot.lane.b32.xlu0 %v2002_v34, %s3669_s23  ;;  %v2231_v13 = vpop.permute.xlu0 %2230 }
 0x225   : > { %3501 = vmatprep.mubr.msk.f32.mxu0 %vm1040_vm5, %v5067_v55 }
 0x228   : > { %3502 = vmatmul.mubr.msk.f32.gmra.mxu0 %vm1040_vm5, %v5064_v8  ;;  %v2233_v8 = vpop.permute.xlu1 %2232 }
 0x229   : > { %3504 = vmatprep.mubr.msk.f32.mxu0 %vm1040_vm5, %v5096_v49 }
 0x22b   : > { %v3460_v11 = vpop.f32.mrf.mxu1 }
 0x22c   : > { %v2017_v1 = vadd.f32 %v3460_v11, %v4920_v59  ;;  %3505 = vmatmul.mubr.msk.f32.gmra.mxu0 %vm1040_vm5, %v5093_v63 }
 0x22d   : > { %v2011_v21 = vpop.f32.mrf.mxu1  ;;  %3507 = vmatprep.mubr.msk.f32.mxu0 %vm1040_vm5, %v5126_v2  ;;  %v3642_v2 = vld [vmem:[%s4485_s13] sm:$0xff] }
 0x22e   : > { %v2012_v29 = vadd.f32 %v4920_v59, %v2011_v21  ;;  %2144 = vrot.lane.b32.xlu1 %v2017_v1, %s3669_s23 }
 0x230   : > { %3508 = vmatmul.mubr.msk.f32.gmra.mxu0 %vm1040_vm5, %v5123_v10  ;;  %2142 = vrot.lane.b32.xlu0 %v2012_v29, %s3669_s23  ;;  %v2237_v10 = vpop.permute.xlu0 %2236 }
 0x231   : > { %3510 = vmatprep.mubr.msk.f32.mxu0 %vm1040_vm5, %v5153_v22  ;;  %v2239_v22 = vpop.permute.xlu1 %2238 }
 0x234   : > { %3511 = vmatmul.mubr.msk.f32.gmra.mxu0 %vm1040_vm5, %v5150_v52  ;;  %v2248_v52 = vsel %vm933_vm2, %v3642_v2, %v2231_v13  ;;  %v2243_v33 = vpop.permute.xlu0 %2242 }
 0x235   : > { %3513 = vmatprep.mubr.msk.f32.mxu0 %vm1040_vm5, %v5176_v44  ;;  %v2245_v51 = vpop.permute.xlu1 %2244 }
 0x237   : > { %v3463_v24 = vpop.f32.mrf.mxu1 }
 0x238   : > { %v2027_v55 = vadd.f32 %v3463_v24, %v4920_v59  ;;  %3514 = vmatmul.mubr.msk.f32.gmra.mxu0 %vm1040_vm5, %v5173_v46  ;;  %v3643_v46 = vld [vmem:[%s4485_s13 + $0x8] sm:$0xff]  ;;  %v2103_v0 = vpop.permute.xlu0 %2102 }
 0x239   : > { %v2021_v63 = vpop.f32.mrf.mxu1  ;;  %3516 = vmatprep.mubr.msk.f32.mxu0 %vm1040_vm5, %v5198_v26  ;;  %v2249_v44 = vsel %vm933_vm2, %v3643_v46, %v2233_v8  ;;  %v2250_v26 = vsel %vm966_vm3, %v2248_v52, %v2237_v10 }
 0x23a   : > { %v2022_v49 = vadd.f32 %v4920_v59, %v2021_v63  ;;  %2148 = vrot.lane.b32.xlu1 %v2027_v55, %s3669_s23  ;;  %v2252_v7 = vsel %vm999_vm4, %v2250_v26, %v2243_v33 }
 0x23c   : > { %3517 = vmatmul.mubr.msk.f32.gmra.mxu0 %vm1040_vm5, %v5195_v56  ;;  %2146 = vrot.lane.b32.xlu0 %v2022_v49, %s3669_s23  ;;  %v2251_v56 = vsel %vm966_vm3, %v2249_v44, %v2239_v22  ;;  %v2107_v35 = vpop.permute.xlu0 %2106 }
 0x23d   : > { %3519 = vmatprep.mubr.msk.f32.mxu0 %vm1040_vm5, %v5217_v4  ;;  %v2253_v3 = vsel %vm999_vm4, %v2251_v56, %v2245_v51 }
 0x240   : > { %3520 = vmatmul.mubr.msk.f32.gmra.mxu0 %vm1040_vm5, %v5214_v19 }
 0x241   : > { %3522 = vmatprep.mubr.msk.f32.mxu0 %vm1040_vm5, %v5238_v30 }
 0x243   : > { %v3466_v38 = vpop.f32.mrf.mxu1  ;;  %v2111_v21 = vpop.permute.xlu0 %2110 }
 0x244   : > { %v2037_v42 = vadd.f32 %v3466_v38, %v4920_v59  ;;  %3523 = vmatmul.mubr.msk.f32.gmra.mxu0 %vm1040_vm5, %v5235_v39  ;;  %v2105_v39 = vpop.permute.xlu1 %2104 }
 0x245   : > { %v2031_v4 = vpop.f32.mrf.mxu1  ;;  %3525 = vmatprep.mubr.msk.f32.mxu0 %vm1040_vm5, %v2252_v7 }
 0x246   : > { %v2032_v19 = vadd.f32 %v4920_v59, %v2031_v4  ;;  %2152 = vrot.lane.b32.xlu1 %v2037_v42, %s3669_s23 }
 0x248   : > { %2150 = vrot.lane.b32.xlu0 %v2032_v19, %s3669_s23  ;;  %3526 = vmatmul.mubr.msk.f32.gmra.mxu0 %vm1040_vm5, %v2253_v3  ;;  %v2109_v48 = vpop.permute.xlu1 %2108 }
 0x24c   : > { %v2113_v50 = vpop.permute.xlu1 %2112 }
 0x24e   : > { %v2115_v46 = vpop.permute.xlu0 %2114 }
 0x24f   : > { %v3469_v53 = vpop.f32.mrf.mxu1 }
 0x250   : > { %v2047_v16 = vadd.f32 %v3469_v53, %v4920_v59  ;;  %v2117_v63 = vpop.permute.xlu1 %2116 }
 0x251   : > { %v2041_v15 = vpop.f32.mrf.mxu1 }
 0x252   : > { %v2042_v61 = vadd.f32 %v4920_v59, %v2041_v15  ;;  %2156 = vrot.lane.b32.xlu1 %v2047_v16, %s3669_s23 }
 0x254   : > { %2154 = vrot.lane.b32.xlu0 %v2042_v61, %s3669_s23 }
 0x258   : > { %v2121_v38 = vpop.permute.xlu1 %2120 }
 0x25a   : > { %v2119_v53 = vpop.permute.xlu0 %2118 }
 0x25b   : > { %v3472_v17 = vpop.f32.mrf.mxu1 }
 0x25c   : > { %v2057_v54 = vadd.f32 %v3472_v17, %v4920_v59 }
 0x25d   : > { %v2051_v43 = vpop.f32.mrf.mxu1 }
 0x25e   : > { %v2052_v9 = vadd.f32 %v4920_v59, %v2051_v43  ;;  %2160 = vrot.lane.b32.xlu1 %v2057_v54, %s3669_s23  ;;  %v3378_v20 = vpop.f32.mrf.mxu0 }
 0x25f   : > { %v1209_v25 = vadd.f32 %v3378_v20, %v4920_v59 }
 0x260   : > { %2158 = vrot.lane.b32.xlu0 %v2052_v9, %s3669_s23  ;;  %v1203_v27 = vpop.f32.mrf.mxu0 }
 0x261   : > { %v2199_v30 = vsel %vm933_vm2, %v1209_v25, %v2105_v39  ;;  %v1204_v37 = vadd.f32 %v4920_v59, %v1203_v27 }
 0x262   : > { %2907 = vst.msk [vmem:[%s5359_s30 + $0x8] sm:$0xff] %vm966_vm3, %v2199_v30 }
 0x263   : > { %v2198_v60 = vsel %vm933_vm2, %v1204_v37, %v2103_v0 }
 0x264   : > { %2906 = vst.msk [vmem:[%s5359_s30] sm:$0xff] %vm966_vm3, %v2198_v60  ;;  %v2125_v43 = vpop.permute.xlu1 %2124 }
 0x266   : > { %v2123_v30 = vpop.permute.xlu0 %2122 }
 0x26b   : > { %v3475_v32 = vpop.f32.mrf.mxu1 }
 0x26c   : > { %v2067_v47 = vadd.f32 %v3475_v32, %v4920_v59 }
 0x26d   : > { %v2061_v58 = vpop.f32.mrf.mxu1 }
 0x26e   : > { %v2062_v45 = vadd.f32 %v4920_v59, %v2061_v58  ;;  %2164 = vrot.lane.b32.xlu1 %v2067_v47, %s3669_s23 }
 0x26f   : > { %v3381_v14 = vpop.f32.mrf.mxu0  ;;  %v3534_v36 = vpop.f32.mrf.mxu1 }
 0x270   : > { %v1219_v5 = vadd.f32 %v3381_v14, %v4920_v59  ;;  %v2593_v6 = vadd.f32 %v3534_v36, %v4920_v59  ;;  %2162 = vrot.lane.b32.xlu0 %v2062_v45, %s3669_s23  ;;  %v2129_v58 = vpop.permute.xlu1 %2128 }
 0x271   : > { %v1213_v57 = vpop.f32.mrf.mxu0  ;;  %v2587_v40 = vpop.f32.mrf.mxu1 }
 0x272   : > { %v2201_v41 = vsel %vm933_vm2, %v1219_v5, %v2109_v48  ;;  %v1214_v23 = vadd.f32 %v4920_v59, %v1213_v57  ;;  %v2588_v12 = vadd.f32 %v4920_v59, %v2587_v40  ;;  %2780 = vrot.lane.b32.xlu1 %v2593_v6, %s3669_s23 }
 0x273   : > { %2911 = vst.msk [vmem:[%s5359_s30 + $0x28] sm:$0xff] %vm966_vm3, %v2201_v41  ;;  %v3384_v31 = vpop.f32.mrf.mxu0  ;;  %v3537_v28 = vpop.f32.mrf.mxu1 }
 0x274   : > { %v2200_v62 = vsel %vm933_vm2, %v1214_v23, %v2107_v35  ;;  %v1229_v18 = vadd.f32 %v3384_v31, %v4920_v59  ;;  %v2603_v34 = vadd.f32 %v3537_v28, %v4920_v59  ;;  %2778 = vrot.lane.b32.xlu0 %v2588_v12, %s3669_s23  ;;  %v2127_v35 = vpop.permute.xlu0 %2126 }
 0x275   : > { %2910 = vst.msk [vmem:[%s5359_s30 + $0x20] sm:$0xff] %vm966_vm3, %v2200_v62  ;;  %v1223_v11 = vpop.f32.mrf.mxu0  ;;  %v2597_v1 = vpop.f32.mrf.mxu1 }
 0x276   : > { %v2203_v29 = vsel %vm933_vm2, %v1229_v18, %v2113_v50  ;;  %v1224_v13 = vadd.f32 %v4920_v59, %v1223_v11  ;;  %v2598_v24 = vadd.f32 %v4920_v59, %v2597_v1  ;;  %2784 = vrot.lane.b32.xlu1 %v2603_v34, %s3669_s23 }
 0x277   : > { %2915 = vst.msk [vmem:[%s5359_s30 + $0x48] sm:$0xff] %vm966_vm3, %v2203_v29  ;;  %v3387_v8 = vpop.f32.mrf.mxu0  ;;  %v3540_v55 = vpop.f32.mrf.mxu1 }
 0x278   : > { %v2202_v49 = vsel %vm933_vm2, %v1224_v13, %v2111_v21  ;;  %v1239_v10 = vadd.f32 %v3387_v8, %v4920_v59  ;;  %v2613_v2 = vadd.f32 %v3540_v55, %v4920_v59  ;;  %2782 = vrot.lane.b32.xlu0 %v2598_v24, %s3669_s23 }
 0x279   : > { %2914 = vst.msk [vmem:[%s5359_s30 + $0x40] sm:$0xff] %vm966_vm3, %v2202_v49  ;;  %v1233_v52 = vpop.f32.mrf.mxu0  ;;  %v2607_v22 = vpop.f32.mrf.mxu1 }
 0x27a   : > { %v2205_v44 = vsel %vm933_vm2, %v1239_v10, %v2117_v63  ;;  %v1234_v26 = vadd.f32 %v4920_v59, %v1233_v52  ;;  %v2608_v33 = vadd.f32 %v4920_v59, %v2607_v22  ;;  %2788 = vrot.lane.b32.xlu1 %v2613_v2, %s3669_s23 }
 0x27b   : > { %2919 = vst.msk [vmem:[%s5359_s30 + $0x68] sm:$0xff] %vm966_vm3, %v2205_v44  ;;  %v3390_v56 = vpop.f32.mrf.mxu0  ;;  %v3543_v7 = vpop.f32.mrf.mxu1 }
 0x27c   : > { %v2204_v51 = vsel %vm933_vm2, %v1234_v26, %v2115_v46  ;;  %v1249_v42 = vadd.f32 %v3390_v56, %v4920_v59  ;;  %v2623_v3 = vadd.f32 %v3543_v7, %v4920_v59  ;;  %2786 = vrot.lane.b32.xlu0 %v2608_v33, %s3669_s23  ;;  %v2133_v62 = vpop.permute.xlu1 %2132 }
 0x27d   : > { %2918 = vst.msk [vmem:[%s5359_s30 + $0x60] sm:$0xff] %vm966_vm3, %v2204_v51  ;;  %v1243_v4 = vpop.f32.mrf.mxu0  ;;  %v2617_v19 = vpop.f32.mrf.mxu1 }
 0x27e   : > { %v2207_v16 = vsel %vm933_vm2, %v1249_v42, %v2121_v38  ;;  %v1244_v15 = vadd.f32 %v4920_v59, %v1243_v4  ;;  %v2618_v61 = vadd.f32 %v4920_v59, %v2617_v19  ;;  %2792 = vrot.lane.b32.xlu1 %v2623_v3, %s3669_s23  ;;  %v2131_v29 = vpop.permute.xlu0 %2130 }
 0x27f   : > { %2923 = vst.msk [vmem:[%s5359_s30 + $0x88] sm:$0xff] %vm966_vm3, %v2207_v16  ;;  %v3393_v17 = vpop.f32.mrf.mxu0  ;;  %v3546_v54 = vpop.f32.mrf.mxu1 }
 0x280   : > { %v2206_v9 = vsel %vm933_vm2, %v1244_v15, %v2119_v53  ;;  %v1259_v20 = vadd.f32 %v3393_v17, %v4920_v59  ;;  %v2633_v25 = vadd.f32 %v3546_v54, %v4920_v59  ;;  %2790 = vrot.lane.b32.xlu0 %v2618_v61, %s3669_s23 }
 0x281   : > { %2922 = vst.msk [vmem:[%s5359_s30 + $0x80] sm:$0xff] %vm966_vm3, %v2206_v9  ;;  %v1253_v39 = vpop.f32.mrf.mxu0  ;;  %v2627_v27 = vpop.f32.mrf.mxu1 }
 0x282   : > { %v2209_v37 = vsel %vm933_vm2, %v1259_v20, %v2125_v43  ;;  %v1254_v0 = vadd.f32 %v4920_v59, %v1253_v39  ;;  %v2628_v60 = vadd.f32 %v4920_v59, %v2627_v27  ;;  %2796 = vrot.lane.b32.xlu1 %v2633_v25, %s3669_s23 }
 0x283   : > { %2927 = vst.msk [vmem:[%s5359_s30 + $0xa8] sm:$0xff] %vm966_vm3, %v2209_v37  ;;  %v3396_v32 = vpop.f32.mrf.mxu0  ;;  %v3549_v47 = vpop.f32.mrf.mxu1 }
 0x284   : > { %v2208_v45 = vsel %vm933_vm2, %v1254_v0, %v2123_v30  ;;  %v1269_v14 = vadd.f32 %v3396_v32, %v4920_v59  ;;  %v2643_v36 = vadd.f32 %v3549_v47, %v4920_v59  ;;  %2794 = vrot.lane.b32.xlu0 %v2628_v60, %s3669_s23 }
 0x285   : > { %2926 = vst.msk [vmem:[%s5359_s30 + $0xa0] sm:$0xff] %vm966_vm3, %v2208_v45  ;;  %v1263_v48 = vpop.f32.mrf.mxu0  ;;  %v2637_v5 = vpop.f32.mrf.mxu1 }
 0x286   : > { %v2211_v6 = vsel %vm933_vm2, %v1269_v14, %v2129_v58  ;;  %v1264_v57 = vadd.f32 %v4920_v59, %v1263_v48  ;;  %v2638_v40 = vadd.f32 %v4920_v59, %v2637_v5  ;;  %2800 = vrot.lane.b32.xlu1 %v2643_v36, %s3669_s23 }
 0x287   : > { %2931 = vst.msk [vmem:[%s5359_s30 + $0xc8] sm:$0xff] %vm966_vm3, %v2211_v6  ;;  %v3552_v41 = vpop.f32.mrf.mxu1 }
 0x288   : > { %v2210_v23 = vsel %vm933_vm2, %v1264_v57, %v2127_v35  ;;  %v2653_v12 = vadd.f32 %v3552_v41, %v4920_v59  ;;  %v3399_v31 = vpop.f32.mrf.mxu0  ;;  %2798 = vrot.lane.b32.xlu0 %v2638_v40, %s3669_s23  ;;  %v2137_v22 = vpop.permute.xlu1 %2136  ;;  %v5505_v40 = vld [vmem:[%s5703_s3] ss:$0 sm:$0xff] }
 0x289   : > { %2930 = vst.msk [vmem:[%s5359_s30 + $0xc0] sm:$0xff] %vm966_vm3, %v2210_v23  ;;  %v1279_v28 = vadd.f32 %v3399_v31, %v4920_v59  ;;  %v2647_v50 = vpop.f32.mrf.mxu1 }
 0x28a   : > { %v2648_v18 = vadd.f32 %v4920_v59, %v2647_v50  ;;  %v1273_v34 = vpop.f32.mrf.mxu0  ;;  %2804 = vrot.lane.b32.xlu1 %v2653_v12, %s3669_s23  ;;  %v2135_v7 = vpop.permute.xlu0 %2134 }
 0x28b   : > { %v2213_v11 = vsel %vm933_vm2, %v1279_v28, %v2133_v62  ;;  %v1274_v1 = vadd.f32 %v4920_v59, %v1273_v34  ;;  %v3555_v21 = vpop.f32.mrf.mxu1 }
 0x28c   : > { %2935 = vst.msk [vmem:[%s5359_s30 + $0xe8] sm:$0xff] %vm966_vm3, %v2213_v11  ;;  %v2663_v13 = vadd.f32 %v3555_v21, %v4920_v59  ;;  %2802 = vrot.lane.b32.xlu0 %v2648_v18, %s3669_s23 }
 0x28d   : > { %v2212_v24 = vsel %vm933_vm2, %v1274_v1, %v2131_v29  ;;  %v2657_v8 = vpop.f32.mrf.mxu1 }
 0x28e   : > { %2934 = vst.msk [vmem:[%s5359_s30 + $0xe0] sm:$0xff] %vm966_vm3, %v2212_v24  ;;  %v2658_v55 = vadd.f32 %v4920_v59, %v2657_v8  ;;  %2808 = vrot.lane.b32.xlu1 %v2663_v13, %s3669_s23 }
 0x28f   : > { %v3558_v63 = vpop.f32.mrf.mxu1 }
 0x290   : > { %v2673_v49 = vadd.f32 %v3558_v63, %v4920_v59  ;;  %v3402_v10 = vpop.f32.mrf.mxu0  ;;  %2806 = vrot.lane.b32.xlu0 %v2658_v55, %s3669_s23 }
 0x291   : > { %v1289_v2 = vadd.f32 %v3402_v10, %v4920_v59  ;;  %v2667_v52 = vpop.f32.mrf.mxu1 }
 0x292   : > { %v2668_v46 = vadd.f32 %v4920_v59, %v2667_v52  ;;  %v1283_v44 = vpop.f32.mrf.mxu0  ;;  %2812 = vrot.lane.b32.xlu1 %v2673_v49, %s3669_s23 }
 0x293   : > { %v2215_v26 = vsel %vm933_vm2, %v1289_v2, %v2137_v22  ;;  %v1284_v33 = vadd.f32 %v4920_v59, %v1283_v44  ;;  %v3561_v56 = vpop.f32.mrf.mxu1 }
 0x294   : > { %2939 = vst.msk [vmem:[%s5359_s30 + $0x108] sm:$0xff] %vm966_vm3, %v2215_v26  ;;  %v2683_v38 = vadd.f32 %v3561_v56, %v4920_v59  ;;  %2810 = vrot.lane.b32.xlu0 %v2668_v46, %s3669_s23  ;;  %v2141_v61 = vpop.permute.xlu1 %2140 }
 0x295   : > { %v2214_v51 = vsel %vm933_vm2, %v1284_v33, %v2135_v7  ;;  %v2677_v42 = vpop.f32.mrf.mxu1 }
 0x296   : > { %2938 = vst.msk [vmem:[%s5359_s30 + $0x100] sm:$0xff] %vm966_vm3, %v2214_v51  ;;  %v2678_v3 = vadd.f32 %v4920_v59, %v2677_v42  ;;  %2816 = vrot.lane.b32.xlu1 %v2683_v38, %s3669_s23  ;;  %v2139_v25 = vpop.permute.xlu0 %2138 }
 0x297   : > { %v3564_v4 = vpop.f32.mrf.mxu1 }
 0x298   : > { %v2693_v19 = vadd.f32 %v3564_v4, %v4920_v59  ;;  %v3405_v53 = vpop.f32.mrf.mxu0  ;;  %2814 = vrot.lane.b32.xlu0 %v2678_v3, %s3669_s23 }
 0x299   : > { %v1299_v16 = vadd.f32 %v3405_v53, %v4920_v59  ;;  %v2687_v15 = vpop.f32.mrf.mxu1 }
 0x29a   : > { %v2688_v17 = vadd.f32 %v4920_v59, %v2687_v15  ;;  %v1293_v54 = vpop.f32.mrf.mxu0  ;;  %2820 = vrot.lane.b32.xlu1 %v2693_v19, %s3669_s23 }
 0x29b   : > { %v2217_v43 = vsel %vm933_vm2, %v1299_v16, %v2141_v61  ;;  %v1294_v9 = vadd.f32 %v4920_v59, %v1293_v54  ;;  %v3567_v20 = vpop.f32.mrf.mxu1 }
 0x29c   : > { %2943 = vst.msk [vmem:[%s5359_s30 + $0x128] sm:$0xff] %vm966_vm3, %v2217_v43  ;;  %v2703_v39 = vadd.f32 %v3567_v20, %v4920_v59  ;;  %2818 = vrot.lane.b32.xlu0 %v2688_v17, %s3669_s23 }
 0x29d   : > { %v2216_v27 = vsel %vm933_vm2, %v1294_v9, %v2139_v25  ;;  %v2697_v30 = vpop.f32.mrf.mxu1 }
 0x29e   : > { %2942 = vst.msk [vmem:[%s5359_s30 + $0x120] sm:$0xff] %vm966_vm3, %v2216_v27  ;;  %v2698_v37 = vadd.f32 %v4920_v59, %v2697_v30  ;;  %2824 = vrot.lane.b32.xlu1 %v2703_v39, %s3669_s23 }
 0x29f   : > { %v3570_v0 = vpop.f32.mrf.mxu1 }
 0x2a0   : > { %v2713_v60 = vadd.f32 %v3570_v0, %v4920_v59  ;;  %v3408_v32 = vpop.f32.mrf.mxu0  ;;  %2822 = vrot.lane.b32.xlu0 %v2698_v37, %s3669_s23  ;;  %v2145_v45 = vpop.permute.xlu1 %2144 }
 0x2a1   : > { %v1309_v47 = vadd.f32 %v3408_v32, %v4920_v59  ;;  %v2707_v58 = vpop.f32.mrf.mxu1 }
 0x2a2   : > { %v2708_v14 = vadd.f32 %v4920_v59, %v2707_v58  ;;  %v1303_v36 = vpop.f32.mrf.mxu0  ;;  %2828 = vrot.lane.b32.xlu1 %v2713_v60, %s3669_s23  ;;  %v2143_v57 = vpop.permute.xlu0 %2142 }
 0x2a3   : > { %v2219_v48 = vsel %vm933_vm2, %v1309_v47, %v2145_v45  ;;  %v1304_v5 = vadd.f32 %v4920_v59, %v1303_v36  ;;  %v3573_v6 = vpop.f32.mrf.mxu1 }
 0x2a4   : > { %2947 = vst.msk [vmem:[%s5359_s30 + $0x148] sm:$0xff] %vm966_vm3, %v2219_v48  ;;  %v2723_v35 = vadd.f32 %v5505_v40, %v3573_v6  ;;  %2826 = vrot.lane.b32.xlu0 %v2708_v14, %s3669_s23 }
 0x2a5   : > { %v2218_v41 = vsel %vm933_vm2, %v1304_v5, %v2143_v57  ;;  %v2717_v23 = vpop.f32.mrf.mxu1 }
 0x2a6   : > { %2946 = vst.msk [vmem:[%s5359_s30 + $0x140] sm:$0xff] %vm966_vm3, %v2218_v41  ;;  %v2718_v59 = vadd.f32 %v5505_v40, %v2717_v23  ;;  %2832 = vrot.lane.b32.xlu1 %v2723_v35, %s3669_s23 }
 0x2a7   : > { %v3576_v12 = vpop.f32.mrf.mxu1 }
 0x2a8   : > { %v2733_v31 = vadd.f32 %v5505_v40, %v3576_v12  ;;  %v3411_v28 = vpop.f32.mrf.mxu0  ;;  %2830 = vrot.lane.b32.xlu0 %v2718_v59, %s3669_s23 }
 0x2a9   : > { %v2727_v50 = vpop.f32.mrf.mxu1  ;;  %v1319_v34 = vadd.f32 %v5505_v40, %v3411_v28 }
 0x2aa   : > { %v2728_v62 = vadd.f32 %v5505_v40, %v2727_v50  ;;  %v1313_v18 = vpop.f32.mrf.mxu0  ;;  %2836 = vrot.lane.b32.xlu1 %v2733_v31, %s3669_s23 }
 0x2ab   : > { %v1314_v1 = vadd.f32 %v5505_v40, %v1313_v18 }
 0x2ac   : > { %v2149_v11 = vpop.permute.xlu1 %2148  ;;  %2834 = vrot.lane.b32.xlu0 %v2728_v62, %s3669_s23 }
 0x2ad   : > { %v2221_v21 = vsel %vm933_vm2, %v1319_v34, %v2149_v11 }
 0x2ae   : > { %2951 = vst.msk [vmem:[%s5359_s30 + $0x168] sm:$0xff] %vm966_vm3, %v2221_v21  ;;  %v2147_v29 = vpop.permute.xlu0 %2146 }
 0x2af   : > { %v2220_v13 = vsel %vm933_vm2, %v1314_v1, %v2147_v29 }
 0x2b0   : > { %2950 = vst.msk [vmem:[%s5359_s30 + $0x160] sm:$0xff] %vm966_vm3, %v2220_v13  ;;  %v3414_v24 = vpop.f32.mrf.mxu0 }
 0x2b1   : > { %v1329_v55 = vadd.f32 %v5505_v40, %v3414_v24 }
 0x2b2   : > { %v1323_v8 = vpop.f32.mrf.mxu0 }
 0x2b3   : > { %v1324_v49 = vadd.f32 %v5505_v40, %v1323_v8 }
 0x2b8   : > { %v2153_v63 = vpop.permute.xlu1 %2152  ;;  %v3417_v22 = vpop.f32.mrf.mxu0 }
 0x2b9   : > { %v2223_v10 = vsel %vm933_vm2, %v1329_v55, %v2153_v63  ;;  %v1339_v26 = vadd.f32 %v5505_v40, %v3417_v22 }
 0x2ba   : > { %2955 = vst.msk [vmem:[%s5359_s30 + $0x188] sm:$0xff] %vm966_vm3, %v2223_v10  ;;  %v2151_v2 = vpop.permute.xlu0 %2150  ;;  %v1333_v46 = vpop.f32.mrf.mxu0 }
 0x2bb   : > { %v2222_v52 = vsel %vm933_vm2, %v1324_v49, %v2151_v2  ;;  %v1334_v56 = vadd.f32 %v5505_v40, %v1333_v46 }
 0x2bc   : > { %2954 = vst.msk [vmem:[%s5359_s30 + $0x180] sm:$0xff] %vm966_vm3, %v2222_v52 }
 0x2c0   : > { %v3420_v44 = vpop.f32.mrf.mxu0 }
 0x2c1   : > { %v1349_v16 = vadd.f32 %v5505_v40, %v3420_v44 }
 0x2c2   : > { %v1343_v38 = vpop.f32.mrf.mxu0 }
 0x2c3   : > { %v1344_v17 = vadd.f32 %v5505_v40, %v1343_v38 }
 0x2c4   : > { %v2157_v33 = vpop.permute.xlu1 %2156 }
 0x2c5   : > { %v2225_v7 = vsel %vm933_vm2, %v1339_v26, %v2157_v33 }
 0x2c6   : > { %2959 = vst.msk [vmem:[%s5359_s30 + $0x1a8] sm:$0xff] %vm966_vm3, %v2225_v7  ;;  %v2155_v51 = vpop.permute.xlu0 %2154 }
 0x2c7   : > { %v2224_v42 = vsel %vm933_vm2, %v1334_v56, %v2155_v51 }
 0x2c8   : > { %2958 = vst.msk [vmem:[%s5359_s30 + $0x1a0] sm:$0xff] %vm966_vm3, %v2224_v42  ;;  %v3423_v3 = vpop.f32.mrf.mxu0 }
 0x2c9   : > { %v1359_v45 = vadd.f32 %v5505_v40, %v3423_v3 }
 0x2ca   : > { %v1353_v4 = vpop.f32.mrf.mxu0 }
 0x2cb   : > { %v1354_v48 = vadd.f32 %v5505_v40, %v1353_v4 }
 0x2cc   : > { %v3482_v19 = vpop.f32.mrf.mxu0 }
 0x2cd   : > { %v2335_v35 = vadd.f32 %v5505_v40, %v3482_v19 }
 0x2ce   : > { %v2329_v53 = vpop.f32.mrf.mxu0 }
 0x2cf   : > { %v2330_v12 = vadd.f32 %v5505_v40, %v2329_v53 }
 0x2d0   : > { %v3485_v15 = vpop.f32.mrf.mxu0  ;;  %v2161_v61 = vpop.permute.xlu1 %2160 }
 0x2d1   : > { %v2227_v54 = vsel %vm933_vm2, %v1349_v16, %v2161_v61  ;;  %v2345_v62 = vadd.f32 %v5505_v40, %v3485_v15 }
 0x2d2   : > { %2963 = vst.msk [vmem:[%s5359_s30 + $0x1c8] sm:$0xff] %vm966_vm3, %v2227_v54  ;;  %v2339_v43 = vpop.f32.mrf.mxu0  ;;  %v2159_v9 = vpop.permute.xlu0 %2158 }
 0x2d3   : > { %v2226_v20 = vsel %vm933_vm2, %v1344_v17, %v2159_v9  ;;  %v2340_v1 = vadd.f32 %v5505_v40, %v2339_v43 }
 0x2d4   : > { %2962 = vst.msk [vmem:[%s5359_s30 + $0x1c0] sm:$0xff] %vm966_vm3, %v2226_v20  ;;  %v3488_v25 = vpop.f32.mrf.mxu0  ;;  %v3579_v39 = vpop.f32.mrf.mxu1 }
 0x2d5   : > { %v2743_v27 = vadd.f32 %v5505_v40, %v3579_v39  ;;  %v2355_v24 = vadd.f32 %v5505_v40, %v3488_v25 }
 0x2d6   : > { %v2349_v30 = vpop.f32.mrf.mxu0  ;;  %v2737_v37 = vpop.f32.mrf.mxu1 }
 0x2d7   : > { %v2738_v0 = vadd.f32 %v5505_v40, %v2737_v37  ;;  %2840 = vrot.lane.b32.xlu1 %v2743_v27, %s3669_s23  ;;  %v2350_v49 = vadd.f32 %v5505_v40, %v2349_v30 }
 0x2d8   : > { %v3491_v60 = vpop.f32.mrf.mxu0 }
 0x2d9   : > { %2838 = vrot.lane.b32.xlu0 %v2738_v0, %s3669_s23  ;;  %v2365_v22 = vadd.f32 %v5505_v40, %v3491_v60 }
 0x2da   : > { %v2359_v32 = vpop.f32.mrf.mxu0 }
 0x2db   : > { %v2360_v33 = vadd.f32 %v5505_v40, %v2359_v32 }
 0x2dc   : > { %v3494_v47 = vpop.f32.mrf.mxu0 }
 0x2dd   : > { %v2375_v51 = vadd.f32 %v5505_v40, %v3494_v47 }
 0x2de   : > { %v2369_v58 = vpop.f32.mrf.mxu0 }
 0x2df   : > { %v2370_v4 = vadd.f32 %v5505_v40, %v2369_v58 }
 0x2e0   : > { %v3497_v14 = vpop.f32.mrf.mxu0  ;;  %v2165_v36 = vpop.permute.xlu1 %2164 }
 0x2e1   : > { %v2229_v5 = vsel %vm933_vm2, %v1359_v45, %v2165_v36  ;;  %v2385_v15 = vadd.f32 %v5505_v40, %v3497_v14 }
 0x2e2   : > { %2967 = vst.msk [vmem:[%s5359_s30 + $0x1e8] sm:$0xff] %vm966_vm3, %v2229_v5  ;;  %v2379_v6 = vpop.f32.mrf.mxu0  ;;  %v2163_v57 = vpop.permute.xlu0 %2162 }
 0x2e3   : > { %v2228_v41 = vsel %vm933_vm2, %v1354_v48, %v2163_v57  ;;  %v2380_v54 = vadd.f32 %v5505_v40, %v2379_v6 }
 0x2e4   : > { %2966 = vst.msk [vmem:[%s5359_s30 + $0x1e0] sm:$0xff] %vm966_vm3, %v2228_v41  ;;  %v3500_v23 = vpop.f32.mrf.mxu0  ;;  %v2781_v59 = vpop.permute.xlu1 %2780 }
 0x2e5   : > { %v2875_v31 = vsel %vm933_vm2, %v2335_v35, %v2781_v59  ;;  %v2395_v25 = vadd.f32 %v5505_v40, %v3500_v23 }
 0x2e6   : > { %2909 = vst.msk [vmem:[%s5359_s30 + $0x18] sm:$0xff] %vm966_vm3, %v2875_v31  ;;  %v2389_v28 = vpop.f32.mrf.mxu0  ;;  %v2779_v50 = vpop.permute.xlu0 %2778 }
 0x2e7   : > { %v2874_v18 = vsel %vm933_vm2, %v2330_v12, %v2779_v50  ;;  %v2390_v30 = vadd.f32 %v5505_v40, %v2389_v28 }
 0x2e8   : > { %2908 = vst.msk [vmem:[%s5359_s30 + $0x10] sm:$0xff] %vm966_vm3, %v2874_v18  ;;  %v3503_v34 = vpop.f32.mrf.mxu0  ;;  %v2785_v11 = vpop.permute.xlu1 %2784 }
 0x2e9   : > { %v2877_v21 = vsel %vm933_vm2, %v2345_v62, %v2785_v11  ;;  %v2405_v32 = vadd.f32 %v5505_v40, %v3503_v34 }
 0x2ea   : > { %2913 = vst.msk [vmem:[%s5359_s30 + $0x38] sm:$0xff] %vm966_vm3, %v2877_v21  ;;  %v2399_v29 = vpop.f32.mrf.mxu0  ;;  %v2783_v13 = vpop.permute.xlu0 %2782 }
 0x2eb   : > { %v2876_v8 = vsel %vm933_vm2, %v2340_v1, %v2783_v13  ;;  %v2400_v45 = vadd.f32 %v5505_v40, %v2399_v29 }
 0x2ec   : > { %2912 = vst.msk [vmem:[%s5359_s30 + $0x30] sm:$0xff] %vm966_vm3, %v2876_v8  ;;  %v3506_v55 = vpop.f32.mrf.mxu0  ;;  %v2789_v63 = vpop.permute.xlu1 %2788 }
 0x2ed   : > { %v2879_v10 = vsel %vm933_vm2, %v2355_v24, %v2789_v63  ;;  %v2415_v5 = vadd.f32 %v5505_v40, %v3506_v55 }
 0x2ee   : > { %2917 = vst.msk [vmem:[%s5359_s30 + $0x58] sm:$0xff] %vm966_vm3, %v2879_v10  ;;  %v2409_v2 = vpop.f32.mrf.mxu0  ;;  %v2787_v52 = vpop.permute.xlu0 %2786 }
 0x2ef   : > { %v2878_v46 = vsel %vm933_vm2, %v2350_v49, %v2787_v52  ;;  %v2410_v35 = vadd.f32 %v5505_v40, %v2409_v2 }
 0x2f0   : > { %2916 = vst.msk [vmem:[%s5359_s30 + $0x50] sm:$0xff] %vm966_vm3, %v2878_v46  ;;  %v3509_v44 = vpop.f32.mrf.mxu0  ;;  %v2793_v26 = vpop.permute.xlu1 %2792 }
 0x2f1   : > { %v2881_v56 = vsel %vm933_vm2, %v2365_v22, %v2793_v26  ;;  %v2425_v12 = vadd.f32 %v5505_v40, %v3509_v44 }
 0x2f2   : > { %2921 = vst.msk [vmem:[%s5359_s30 + $0x78] sm:$0xff] %vm966_vm3, %v2881_v56  ;;  %v2419_v7 = vpop.f32.mrf.mxu0  ;;  %v2791_v38 = vpop.permute.xlu0 %2790 }
 0x2f3   : > { %v2880_v42 = vsel %vm933_vm2, %v2360_v33, %v2791_v38  ;;  %v2420_v50 = vadd.f32 %v5505_v40, %v2419_v7 }
 0x2f4   : > { %2920 = vst.msk [vmem:[%s5359_s30 + $0x70] sm:$0xff] %vm966_vm3, %v2880_v42  ;;  %v2797_v3 = vpop.permute.xlu1 %2796  ;;  %v3512_v53 = vpop.f32.mrf.mxu0 }
 0x2f5   : > { %v2883_v19 = vsel %vm933_vm2, %v2375_v51, %v2797_v3  ;;  %v2435_v11 = vadd.f32 %v5505_v40, %v3512_v53 }
 0x2f6   : > { %2925 = vst.msk [vmem:[%s5359_s30 + $0x98] sm:$0xff] %vm966_vm3, %v2883_v19  ;;  %v2795_v16 = vpop.permute.xlu0 %2794  ;;  %v2429_v9 = vpop.f32.mrf.mxu0 }
 0x2f7   : > { %v2882_v61 = vsel %vm933_vm2, %v2370_v4, %v2795_v16  ;;  %v2430_v29 = vadd.f32 %v5505_v40, %v2429_v9 }
 0x2f8   : > { %2924 = vst.msk [vmem:[%s5359_s30 + $0x90] sm:$0xff] %vm966_vm3, %v2882_v61  ;;  %v2801_v17 = vpop.permute.xlu1 %2800  ;;  %v3515_v0 = vpop.f32.mrf.mxu0 }
 0x2f9   : > { %v2885_v43 = vsel %vm933_vm2, %v2385_v15, %v2801_v17  ;;  %v2445_v55 = vadd.f32 %v5505_v40, %v3515_v0 }
 0x2fa   : > { %2929 = vst.msk [vmem:[%s5359_s30 + $0xb8] sm:$0xff] %vm966_vm3, %v2885_v43  ;;  %v2799_v20 = vpop.permute.xlu0 %2798  ;;  %v2439_v36 = vpop.f32.mrf.mxu0 }
 0x2fb   : > { %v2884_v39 = vsel %vm933_vm2, %v2380_v54, %v2799_v20  ;;  %v2440_v10 = vadd.f32 %v5505_v40, %v2439_v36 }
 0x2fc   : > { %2928 = vst.msk [vmem:[%s5359_s30 + $0xb0] sm:$0xff] %vm966_vm3, %v2884_v39  ;;  %v2805_v27 = vpop.permute.xlu1 %2804  ;;  %v3518_v23 = vpop.f32.mrf.mxu0 }
 0x2fd   : > { %v2887_v37 = vsel %vm933_vm2, %v2395_v25, %v2805_v27  ;;  %v2455_v46 = vadd.f32 %v5505_v40, %v3518_v23 }
 0x2fe   : > { %2933 = vst.msk [vmem:[%s5359_s30 + $0xd8] sm:$0xff] %vm966_vm3, %v2887_v37  ;;  %v2803_v60 = vpop.permute.xlu0 %2802  ;;  %v2449_v18 = vpop.f32.mrf.mxu0 }
 0x2ff   : > { %v2886_v47 = vsel %vm933_vm2, %v2390_v30, %v2803_v60  ;;  %v2450_v33 = vadd.f32 %v5505_v40, %v2449_v18 }
 0x300   : > { %2932 = vst.msk [vmem:[%s5359_s30 + $0xd0] sm:$0xff] %vm966_vm3, %v2886_v47  ;;  %v2809_v58 = vpop.permute.xlu1 %2808  ;;  %v3521_v24 = vpop.f32.mrf.mxu0 }
 0x301   : > { %v2889_v14 = vsel %vm933_vm2, %v2405_v32, %v2809_v58  ;;  %v2465_v51 = vadd.f32 %v5505_v40, %v3521_v24 }
 0x302   : > { %2937 = vst.msk [vmem:[%s5359_s30 + $0xf8] sm:$0xff] %vm966_vm3, %v2889_v14  ;;  %v2807_v48 = vpop.permute.xlu0 %2806  ;;  %v2459_v52 = vpop.f32.mrf.mxu0 }
 0x303   : > { %v2888_v6 = vsel %vm933_vm2, %v2400_v45, %v2807_v48  ;;  %v2460_v4 = vadd.f32 %v5505_v40, %v2459_v52 }
 0x304   : > { %2936 = vst.msk [vmem:[%s5359_s30 + $0xf0] sm:$0xff] %vm966_vm3, %v2888_v6  ;;  %v2813_v57 = vpop.permute.xlu1 %2812  ;;  %v3524_v7 = vpop.f32.mrf.mxu0 }
 0x305   : > { %v2891_v41 = vsel %vm933_vm2, %v2415_v5, %v2813_v57  ;;  %v2475_v15 = vadd.f32 %v5505_v40, %v3524_v7 }
 0x306   : > { %2941 = vst.msk [vmem:[%s5359_s30 + $0x118] sm:$0xff] %vm966_vm3, %v2891_v41  ;;  %v2811_v59 = vpop.permute.xlu0 %2810  ;;  %v2469_v53 = vpop.f32.mrf.mxu0 }
 0x307   : > { %v2890_v31 = vsel %vm933_vm2, %v2410_v35, %v2811_v59  ;;  %v2470_v54 = vadd.f32 %v5505_v40, %v2469_v53 }
 0x308   : > { %2940 = vst.msk [vmem:[%s5359_s30 + $0x110] sm:$0xff] %vm966_vm3, %v2890_v31  ;;  %v2817_v28 = vpop.permute.xlu1 %2816  ;;  %v3527_v25 = vpop.f32.mrf.mxu0 }
 0x309   : > { %v2893_v62 = vsel %vm933_vm2, %v2425_v12, %v2817_v28  ;;  %v2485_v27 = vadd.f32 %v5505_v40, %v3527_v25 }
 0x30a   : > { %2945 = vst.msk [vmem:[%s5359_s30 + $0x138] sm:$0xff] %vm966_vm3, %v2893_v62  ;;  %v2815_v34 = vpop.permute.xlu0 %2814  ;;  %v2479_v39 = vpop.f32.mrf.mxu0 }
 0x30b   : > { %v2892_v1 = vsel %vm933_vm2, %v2420_v50, %v2815_v34  ;;  %v2480_v37 = vadd.f32 %v5505_v40, %v2479_v39 }
 0x30c   : > { %2944 = vst.msk [vmem:[%s5359_s30 + $0x130] sm:$0xff] %vm966_vm3, %v2892_v1  ;;  %v2821_v21 = vpop.permute.xlu1 %2820 }
 0x30d   : > { %v2895_v13 = vsel %vm933_vm2, %v2435_v11, %v2821_v21 }
 0x30e   : > { %2949 = vst.msk [vmem:[%s5359_s30 + $0x158] sm:$0xff] %vm966_vm3, %v2895_v13  ;;  %v2819_v8 = vpop.permute.xlu0 %2818 }
 0x30f   : > { %v2894_v63 = vsel %vm933_vm2, %v2430_v29, %v2819_v8 }
 0x310   : > { %2948 = vst.msk [vmem:[%s5359_s30 + $0x150] sm:$0xff] %vm966_vm3, %v2894_v63  ;;  %v2825_v49 = vpop.permute.xlu1 %2824 }
 0x311   : > { %v2897_v2 = vsel %vm933_vm2, %v2445_v55, %v2825_v49 }
 0x312   : > { %2953 = vst.msk [vmem:[%s5359_s30 + $0x178] sm:$0xff] %vm966_vm3, %v2897_v2  ;;  %v2823_v22 = vpop.permute.xlu0 %2822 }
 0x313   : > { %v2896_v44 = vsel %vm933_vm2, %v2440_v10, %v2823_v22 }
 0x314   : > { %2952 = vst.msk [vmem:[%s5359_s30 + $0x170] sm:$0xff] %vm966_vm3, %v2896_v44  ;;  %v2829_v26 = vpop.permute.xlu1 %2828 }
 0x315   : > { %v2899_v56 = vsel %vm933_vm2, %v2455_v46, %v2829_v26 }
 0x316   : > { %2957 = vst.msk [vmem:[%s5359_s30 + $0x198] sm:$0xff] %vm966_vm3, %v2899_v56  ;;  %v2827_v38 = vpop.permute.xlu0 %2826 }
 0x317   : > { %v2898_v42 = vsel %vm933_vm2, %v2450_v33, %v2827_v38 }
 0x318   : > { %2956 = vst.msk [vmem:[%s5359_s30 + $0x190] sm:$0xff] %vm966_vm3, %v2898_v42  ;;  %v2833_v3 = vpop.permute.xlu1 %2832 }
 0x319   : > { %v2901_v19 = vsel %vm933_vm2, %v2465_v51, %v2833_v3 }
 0x31a   : > { %2961 = vst.msk [vmem:[%s5359_s30 + $0x1b8] sm:$0xff] %vm966_vm3, %v2901_v19  ;;  %v2831_v16 = vpop.permute.xlu0 %2830 }
 0x31b   : > { %v2900_v61 = vsel %vm933_vm2, %v2460_v4, %v2831_v16 }
 0x31c   : > { %2960 = vst.msk [vmem:[%s5359_s30 + $0x1b0] sm:$0xff] %vm966_vm3, %v2900_v61  ;;  %v2837_v17 = vpop.permute.xlu1 %2836 }
 0x31d   : > { %v2903_v43 = vsel %vm933_vm2, %v2475_v15, %v2837_v17 }
 0x31e   : > { %2965 = vst.msk [vmem:[%s5359_s30 + $0x1d8] sm:$0xff] %vm966_vm3, %v2903_v43  ;;  %v2835_v9 = vpop.permute.xlu0 %2834 }
 0x31f   : > { %v2902_v20 = vsel %vm933_vm2, %v2470_v54, %v2835_v9 }
 0x320   : > { %2964 = vst.msk [vmem:[%s5359_s30 + $0x1d0] sm:$0xff] %vm966_vm3, %v2902_v20 }
 0x349   : > { %v2841_v30 = vpop.permute.xlu1 %2840 }
 0x34a   : > { %v2905_v0 = vsel %vm933_vm2, %v2485_v27, %v2841_v30 }
 0x34b   : > { %2969 = vst.msk [vmem:[%s5359_s30 + $0x1f8] sm:$0xff] %vm966_vm3, %v2905_v0  ;;  %v2839_v60 = vpop.permute.xlu0 %2838 }
 0x34c   : > { %v2904_v32 = vsel %vm933_vm2, %v2480_v37, %v2839_v60 }
 0x34d   : > { %2968 = vst.msk [vmem:[%s5359_s30 + $0x1f0] sm:$0xff] %vm966_vm3, %v2904_v32 }
 0x34e PF: > { %s14_s17 = sadd.s32 1, %s3667_s17   ;;  %s5886_s15 = smov %s3663_s16 }
 0x34f   : > { %p11_p5 = scmp.ge.s32.totalorder %s14_s17, 4   ;;  %s5887_s16 = smov %s5889_s18 }
 0x351   :  { %13 = sbr.rel (!%p11_p5) target bundleno = 2 (0x2), region = 72 }

</bundles_post_ra>
